<compile_context>
chip_gen: v6e
topology: v6e:2x2x1
jax: 0.10.0
libtpu: 0.0.40
codegen_flags: <defaults>
</compile_context>

<pallas_src>
import functools

import jax
import jax.numpy as jnp
from jax.experimental import pallas as pl
from jax.experimental.pallas import tpu as pltpu


# ------------------------------ Fused kernel --------------------------------

def _shvit_block_kernel(B_blk, H, W, pdim, qk_dim, scale,
                        x_ref, dw_w_ref, dw_b_ref,
                        gn_g_ref, gn_b_ref,
                        wqkv_ref, bqkv_ref,
                        wpa_ref, wpb_ref, bproj_ref,
                        w1_ref, b1_ref, w2_ref, b2_ref,
                        out_ref):
    """A block of B_blk images: conv-residual -> SHSA-residual -> FFN-residual."""
    C = out_ref.shape[-1]
    N = H * W
    M = B_blk * N                       # stacked matmul rows (>=128 at toy size)
    MH = B_blk * H

    # ---- stage 1: x = x + BN(DWConv3x3(x)); residual folded into center tap.
    # Unpadded input; boundary taps are masked with iota row/col masks.
    xf = x_ref[...].astype(jnp.float32).reshape(MH, W, C)          # (B*H, W, C)
    hloc = jax.lax.broadcasted_iota(jnp.int32, (B_blk, H, W, 1), 1).reshape(MH, W, 1)
    wloc = jax.lax.broadcasted_iota(jnp.int32, (B_blk, H, W, 1), 2).reshape(MH, W, 1)

    acc = jnp.broadcast_to(dw_b_ref[...][None], (MH, W, C)).astype(jnp.float32)
    for dx in range(3):
        ox = dx - 1
        # Width shift rides the XLU (sublane roll); wrapped columns are masked.
        xs = xf if ox == 0 else pltpu.roll(xf, shift=(-ox) % W, axis=1)
        w_ok = jnp.logical_and(wloc + ox >= 0, wloc + ox < W)
        for dy in range(3):
            oy = dy - 1
            if oy == 0:
                sh = xs
            elif oy > 0:                # sh[i] = xs[i+oy]; edge rows are masked
                sh = jnp.concatenate([xs[oy:], xs[-oy:]], axis=0)
            else:                       # sh[i] = xs[i+oy] (oy < 0)
                sh = jnp.concatenate([xs[:-oy], xs[:oy]], axis=0)
            tap_w = dw_w_ref[dy * 3 + dx, :][None, None, :]        # (1, 1, C)
            if oy == 0 and ox == 0:
                acc = acc + xs * tap_w                             # center tap (+identity)
            else:
                ok = jnp.logical_and(
                    w_ok, jnp.logical_and(hloc + oy >= 0, hloc + oy < H))
                acc = acc + jnp.where(ok, sh, 0.0) * tap_w
    x = acc.reshape(M, C)                                          # (B*N, C) f32

    # ---- stage 2: x = x + SHSA(x)
    # GroupNorm(1 group) statistics over the first pdim channels per image,
    # computed with a lane mask (no unaligned x1/x2 lane slicing).
    lane = jax.lax.broadcasted_iota(jnp.int32, (1, C), 1)
    pmask = lane < pdim
    xm3 = jnp.where(pmask, x, 0.0).reshape(B_blk, N, C)
    x3 = x.reshape(B_blk, N, C)
    cnt = float(N * pdim)
    s1 = jnp.sum(jnp.sum(xm3, axis=2, keepdims=True), axis=1, keepdims=True)
    s2 = jnp.sum(jnp.sum(xm3 * xm3, axis=2, keepdims=True), axis=1, keepdims=True)
    mean = s1 / cnt
    var = s2 / cnt - mean * mean
    # Zero-padded gamma/beta -> channels >= pdim become exactly 0 after affine.
    x1n = (x3 - mean) * jax.lax.rsqrt(var + 1e-5)
    x1n = x1n * gn_g_ref[...][None] + gn_b_ref[...][None]

    # Fused qkv projection on the stacked rows (single 64-wide matmul, bf16).
    qkv = jnp.dot(x1n.reshape(M, C).astype(jnp.bfloat16), wqkv_ref[...],
                  preferred_element_type=jnp.float32) + bqkv_ref[...]
    qkv = qkv.reshape(B_blk, N, 2 * qk_dim + pdim)
    q = qkv[:, :, :qk_dim].astype(jnp.bfloat16)
    k = qkv[:, :, qk_dim:2 * qk_dim].astype(jnp.bfloat16)
    v = qkv[:, :, 2 * qk_dim:].astype(jnp.bfloat16)

    # Per-image attention (batched einsums), softmax in f32.
    attn = jnp.einsum('bqd,bkd->bqk', q, k,
                      preferred_element_type=jnp.float32) * scale
    attn = attn - jnp.max(attn, axis=-1, keepdims=True)
    p = jnp.exp(attn)
    p = p * pl.reciprocal(jnp.sum(p, axis=-1, keepdims=True), approx=True)
    o = jnp.einsum('bqk,bkd->bqd', p.astype(jnp.bfloat16), v,
                   preferred_element_type=jnp.float32).reshape(M, pdim)

    # proj on the (virtual) concat [o, x2]: relu(o) @ Wp[:pdim] plus
    # relu(x) @ Wp_pad where Wp_pad has zero rows for channels < pdim.
    y = (jnp.dot(jnp.maximum(o, 0.0).astype(jnp.bfloat16), wpa_ref[...],
                 preferred_element_type=jnp.float32)
         + jnp.dot(jnp.maximum(x, 0.0).astype(jnp.bfloat16), wpb_ref[...],
                   preferred_element_type=jnp.float32)
         + bproj_ref[...])
    x = x + y

    # ---- stage 3: x = x + PW2(ReLU(PW1(x)))
    h = jnp.maximum(
        jnp.dot(x.astype(jnp.bfloat16), w1_ref[...],
                preferred_element_type=jnp.float32) + b1_ref[...], 0.0)
    y2 = jnp.dot(h.astype(jnp.bfloat16), w2_ref[...],
                 preferred_element_type=jnp.float32) + b2_ref[...]
    # TODO(synk): lane-dense (…,128) repack of the store for C < 128.
    out_ref[...] = (x + y2).reshape(B_blk, N, C).astype(out_ref.dtype)


# --------------------------------- Wrapper -----------------------------------

def _full_spec(shape):
    n = len(shape)
    return pl.BlockSpec(shape, lambda b, _n=n: (0,) * _n)


_WEIGHT_NAMES = ("dw_w", "dw_b", "gn_g", "gn_b",
                 "w_qkv", "b_qkv",
                 "w_proj_a", "w_proj_b", "b_proj",
                 "w_pw1", "b_pw1", "w_pw2", "b_pw2")


def shvit_block_forward(x_nchw, p):
    B, C, H, W = x_nchw.shape
    N = H * W
    pdim, qk_dim = p["pdim"], p["qk_dim"]
    scale = float(qk_dim) ** -0.5

    # Block the batch so each grid step feeds >= 128 rows to the MXU.
    b_blk = max(1, min(B, -(-128 // N)))
    while B % b_blk:
        b_blk -= 1

    # TODO(synk): a NHWC-native integration would drop these two transposes.
    x = jnp.transpose(x_nchw, (0, 2, 3, 1))                        # NHWC, no pad

    weights = [p[name] for name in _WEIGHT_NAMES]
    kernel = functools.partial(_shvit_block_kernel,
                               b_blk, H, W, pdim, qk_dim, scale)

    in_specs = [pl.BlockSpec((b_blk, H, W, C), lambda g: (g, 0, 0, 0))]
    in_specs += [_full_spec(w.shape) for w in weights]

    z = pl.pallas_call(
        kernel,
        out_shape=jax.ShapeDtypeStruct((B, N, C), x_nchw.dtype),
        grid=(B // b_blk,),
        in_specs=in_specs,
        out_specs=pl.BlockSpec((b_blk, N, C), lambda g: (g, 0, 0)),
        compiler_params=pltpu.CompilerParams(
            dimension_semantics=("parallel",),
            vmem_limit_bytes=32 * 1024 * 1024),
    )(x, *weights)

    return jnp.transpose(z.reshape(B, H, W, C), (0, 3, 1, 2))      # back to NCHW


# --------------------------- Parameter creation -----------------------------

def _fused_conv_bn(key, out_ch, in_ch_per_group, kh, kw):
    """Random Conv2d weight + BN stats, fused (inference mode)."""
    k1, k2, k3, k4, k5 = jax.random.split(key, 5)
    w = jax.random.normal(k1, (out_ch, in_ch_per_group, kh, kw), jnp.float32) * 0.1
    gamma = jax.random.uniform(k2, (out_ch,), jnp.float32, 0.5, 1.5)
    beta = jax.random.normal(k3, (out_ch,), jnp.float32) * 0.1
    mean = jax.random.normal(k4, (out_ch,), jnp.float32) * 0.1
    var = jax.random.uniform(k5, (out_ch,), jnp.float32, 0.5, 1.5)
    s = gamma / jnp.sqrt(var + 1e-5)
    return w * s[:, None, None, None], beta - mean * s


def make_params(key, dim, qk_dim, pdim):
    keys = jax.random.split(key, 8)
    h = int(dim * 2)
    bf16 = jnp.bfloat16

    dw_wf, dw_bf = _fused_conv_bn(keys[0], dim, 1, 3, 3)            # depthwise 3x3
    gn_g = jax.random.uniform(keys[1], (pdim,), jnp.float32, 0.5, 1.5)
    gn_b = jax.random.normal(keys[2], (pdim,), jnp.float32) * 0.1
    qkv_wf, qkv_bf = _fused_conv_bn(keys[3], 2 * qk_dim + pdim, pdim, 1, 1)
    proj_wf, proj_bf = _fused_conv_bn(keys[4], dim, dim, 1, 1)
    pw1_wf, pw1_bf = _fused_conv_bn(keys[5], h, dim, 1, 1)
    pw2_wf, pw2_bf = _fused_conv_bn(keys[6], dim, h, 1, 1)

    # Channels-last / matmul-ready copies; MXU weights pre-cast to bf16.
    dw_w = jnp.transpose(dw_wf[:, 0], (1, 2, 0)).reshape(9, dim)    # (9, C) f32
    dw_w = dw_w.at[4, :].add(1.0)                                   # fold residual

    # GN affine zero-padded to C lanes (channels >= pdim map to exactly 0).
    gn_g_pad = jnp.zeros((1, dim), jnp.float32).at[0, :pdim].set(gn_g)
    gn_b_pad = jnp.zeros((1, dim), jnp.float32).at[0, :pdim].set(gn_b)

    # qkv weight zero-padded from (pdim, 2qk+pdim) to (C, 2qk+pdim), one matmul.
    w_qkv = jnp.zeros((dim, 2 * qk_dim + pdim), jnp.float32)
    w_qkv = w_qkv.at[:pdim, :].set(qkv_wf[:, :, 0, 0].T)

    w_proj = proj_wf[:, :, 0, 0].T                                  # (C_in, C_out)
    w_proj_b = jnp.zeros((dim, dim), jnp.float32).at[pdim:, :].set(w_proj[pdim:])

    params = {
        "pdim": pdim,
        "qk_dim": qk_dim,
        "dw_w": dw_w,                                               # f32 (VPU path)
        "dw_b": dw_bf.reshape(1, dim),
        "gn_g": gn_g_pad,
        "gn_b": gn_b_pad,
        "w_qkv": w_qkv.astype(bf16),
        "b_qkv": qkv_bf.reshape(1, 2 * qk_dim + pdim),
        "w_proj_a": w_proj[:pdim].astype(bf16),                     # (pdim, C)
        "w_proj_b": w_proj_b.astype(bf16),                          # (C, C), rows<pdim = 0
        "b_proj": proj_bf.reshape(1, dim),
        "w_pw1": pw1_wf[:, :, 0, 0].T.astype(bf16),                 # (C, 2C)
        "b_pw1": pw1_bf.reshape(1, h),
        "w_pw2": pw2_wf[:, :, 0, 0].T.astype(bf16),                 # (2C, C)
        "b_pw2": pw2_bf.reshape(1, dim),
        # OIHW fused f32 copies for the pure-JAX reference
        "ref": dict(dw_wf=dw_wf, dw_bf=dw_bf, gn_g=gn_g, gn_b=gn_b,
                    qkv_wf=qkv_wf, qkv_bf=qkv_bf, proj_wf=proj_wf,
                    proj_bf=proj_bf, pw1_wf=pw1_wf, pw1_bf=pw1_bf,
                    pw2_wf=pw2_wf, pw2_bf=pw2_bf),
    }
    return params


# -------------------------- Pure-JAX reference -------------------------------

def shvit_block_reference(x, p):
    B, C, H, W = x.shape
    pdim, qk_dim = p["pdim"], p["qk_dim"]
    scale = float(qk_dim) ** -0.5
    r = p["ref"]

    # Residual depthwise conv + BN
    y = jax.lax.conv_general_dilated(
        x, r["dw_wf"], (1, 1), ((1, 1), (1, 1)),
        feature_group_count=C, dimension_numbers=("NCHW", "OIHW", "NCHW"))
    x = x + y + r["dw_bf"][None, :, None, None]

    # Residual SHSA
    x1, x2 = x[:, :pdim], x[:, pdim:]
    mean = jnp.mean(x1, axis=(1, 2, 3), keepdims=True)
    var = jnp.mean((x1 - mean) ** 2, axis=(1, 2, 3), keepdims=True)
    x1n = (x1 - mean) / jnp.sqrt(var + 1e-5)
    x1n = x1n * r["gn_g"][None, :, None, None] + r["gn_b"][None, :, None, None]
    qkv = jnp.einsum("oi,bihw->bohw", r["qkv_wf"][:, :, 0, 0], x1n) \
        + r["qkv_bf"][None, :, None, None]
    N = H * W
    q = qkv[:, :qk_dim].reshape(B, qk_dim, N)
    k = qkv[:, qk_dim:2 * qk_dim].reshape(B, qk_dim, N)
    v = qkv[:, 2 * qk_dim:].reshape(B, pdim, N)
    attn = jnp.einsum("bdi,bdj->bij", q, k) * scale
    attn = jax.nn.softmax(attn, axis=-1)
    o = jnp.einsum("bcj,bij->bci", v, attn).reshape(B, pdim, H, W)
    cat = jnp.concatenate([o, x2], axis=1)
    proj = jnp.einsum("oi,bihw->bohw", r["proj_wf"][:, :, 0, 0],
                      jnp.maximum(cat, 0.0)) + r["proj_bf"][None, :, None, None]
    x = x + proj

    # Residual FFN
    hid = jnp.maximum(jnp.einsum("oi,bihw->bohw", r["pw1_wf"][:, :, 0, 0], x)
                      + r["pw1_bf"][None, :, None, None], 0.0)
    y = jnp.einsum("oi,bihw->bohw", r["pw2_wf"][:, :, 0, 0], hid) \
        + r["pw2_bf"][None, :, None, None]
    return x + y


# --------------------------------- Main --------------------------------------

if __name__ == "__main__":
    dim, qk_dim, pdim = 64, 16, 32
    B, H, W = 2, 8, 8

    x = jax.random.normal(jax.random.PRNGKey(0), (B, dim, H, W), jnp.float32)
    params = make_params(jax.random.PRNGKey(42), dim, qk_dim, pdim)

    out = jax.block_until_ready(shvit_block_forward(x, params))
    ref = shvit_block_reference(x, params)

    assert out.shape == x.shape, (out.shape, x.shape)
    # bf16 MXU operands vs f32 reference -> loosened tolerance.
    if not jnp.allclose(out, ref, atol=3e-2, rtol=3e-2):
        max_err = float(jnp.max(jnp.abs(out - ref)))
        raise AssertionError(f"Pallas vs reference mismatch, max abs err = {max_err}")

    print("KERNEL_OK")
</pallas_src>

<mosaic_0001>
module attributes {stable_mosaic.version = 11 : i64} {
  func.func @_shvit_block_kernel(%arg0: i32, %arg1: memref<2x8x8x64xf32, #tpu.memory_space<vmem>>, %arg2: memref<9x64xf32, #tpu.memory_space<vmem>>, %arg3: memref<1x64xf32, #tpu.memory_space<vmem>>, %arg4: memref<1x64xf32, #tpu.memory_space<vmem>>, %arg5: memref<1x64xf32, #tpu.memory_space<vmem>>, %arg6: memref<64x64xbf16, #tpu.memory_space<vmem>>, %arg7: memref<1x64xf32, #tpu.memory_space<vmem>>, %arg8: memref<32x64xbf16, #tpu.memory_space<vmem>>, %arg9: memref<64x64xbf16, #tpu.memory_space<vmem>>, %arg10: memref<1x64xf32, #tpu.memory_space<vmem>>, %arg11: memref<64x128xbf16, #tpu.memory_space<vmem>>, %arg12: memref<1x128xf32, #tpu.memory_space<vmem>>, %arg13: memref<128x64xbf16, #tpu.memory_space<vmem>>, %arg14: memref<1x64xf32, #tpu.memory_space<vmem>>, %arg15: memref<2x64x64xf32, #tpu.memory_space<vmem>>) attributes {dimension_semantics = [#tpu.dimension_semantics<parallel>], iteration_bounds = array<i64: 1>, scalar_prefetch = 0 : i64, scratch_operands = 0 : i64, tpu.core_type = #tpu.core_type<tc>, window_params = [{transform_indices = @transform_0, window_bounds = array<i64: 2, 8, 8, 64>}, {pipeline_mode = #tpu.pipeline_mode<synchronous>, transform_indices = @transform_1, window_bounds = array<i64: 9, 64>}, {pipeline_mode = #tpu.pipeline_mode<synchronous>, transform_indices = @transform_2, window_bounds = array<i64: 1, 64>}, {pipeline_mode = #tpu.pipeline_mode<synchronous>, transform_indices = @transform_3, window_bounds = array<i64: 1, 64>}, {pipeline_mode = #tpu.pipeline_mode<synchronous>, transform_indices = @transform_4, window_bounds = array<i64: 1, 64>}, {pipeline_mode = #tpu.pipeline_mode<synchronous>, transform_indices = @transform_5, window_bounds = array<i64: 64, 64>}, {pipeline_mode = #tpu.pipeline_mode<synchronous>, transform_indices = @transform_6, window_bounds = array<i64: 1, 64>}, {pipeline_mode = #tpu.pipeline_mode<synchronous>, transform_indices = @transform_7, window_bounds = array<i64: 32, 64>}, {pipeline_mode = #tpu.pipeline_mode<synchronous>, transform_indices = @transform_8, window_bounds = array<i64: 64, 64>}, {pipeline_mode = #tpu.pipeline_mode<synchronous>, transform_indices = @transform_9, window_bounds = array<i64: 1, 64>}, {pipeline_mode = #tpu.pipeline_mode<synchronous>, transform_indices = @transform_10, window_bounds = array<i64: 64, 128>}, {pipeline_mode = #tpu.pipeline_mode<synchronous>, transform_indices = @transform_11, window_bounds = array<i64: 1, 128>}, {pipeline_mode = #tpu.pipeline_mode<synchronous>, transform_indices = @transform_12, window_bounds = array<i64: 128, 64>}, {pipeline_mode = #tpu.pipeline_mode<synchronous>, transform_indices = @transform_13, window_bounds = array<i64: 1, 64>}, {transform_indices = @transform_14, window_bounds = array<i64: 2, 64, 64>}]} {
    %c0 = arith.constant 0 : index
    %c0_0 = arith.constant 0 : index
    %c0_1 = arith.constant 0 : index
    %c0_2 = arith.constant 0 : index
    %0 = vector.load %arg1[%c0, %c0_0, %c0_1, %c0_2] : memref<2x8x8x64xf32, #tpu.memory_space<vmem>>, vector<2x8x8x64xf32>
    %1 = vector.shape_cast %0 : vector<2x8x8x64xf32> to vector<16x8x64xf32>
    %2 = tpu.iota {dimensions = array<i32: 1>} : vector<2x8x8x1xi32>
    %3 = vector.shape_cast %2 : vector<2x8x8x1xi32> to vector<16x8x1xi32>
    %4 = tpu.iota {dimensions = array<i32: 2>} : vector<2x8x8x1xi32>
    %5 = vector.shape_cast %4 : vector<2x8x8x1xi32> to vector<16x8x1xi32>
    %c0_3 = arith.constant 0 : index
    %c0_4 = arith.constant 0 : index
    %6 = vector.load %arg3[%c0_3, %c0_4] : memref<1x64xf32, #tpu.memory_space<vmem>>, vector<1x64xf32>
    %7 = vector.shape_cast %6 : vector<1x64xf32> to vector<1x1x64xf32>
    %8 = vector.shape_cast %7 : vector<1x1x64xf32> to vector<1x1x64xf32>
    %9 = vector.broadcast %8 : vector<1x1x64xf32> to vector<16x8x64xf32>
    %c1_i32 = arith.constant 1 : i32
    %10 = tpu.dynamic_rotate %1 by %c1_i32 dim 1 : vector<16x8x64xf32>, i32 -> vector<16x8x64xf32>
    %c-1_i32 = arith.constant -1 : i32
    %11 = vector.broadcast %c-1_i32 : i32 to vector<16x8x1xi32>
    %12 = arith.addi %5, %11 : vector<16x8x1xi32>
    %c0_i32 = arith.constant 0 : i32
    %13 = vector.broadcast %c0_i32 : i32 to vector<16x8x1xi32>
    %14 = arith.cmpi sge, %12, %13 : vector<16x8x1xi32>
    %c-1_i32_5 = arith.constant -1 : i32
    %15 = vector.broadcast %c-1_i32_5 : i32 to vector<16x8x1xi32>
    %16 = arith.addi %5, %15 : vector<16x8x1xi32>
    %c8_i32 = arith.constant 8 : i32
    %17 = vector.broadcast %c8_i32 : i32 to vector<16x8x1xi32>
    %18 = arith.cmpi slt, %16, %17 : vector<16x8x1xi32>
    %19 = arith.andi %14, %18 : vector<16x8x1xi1>
    %20 = vector.extract_strided_slice %10 {offsets = [0, 0, 0], sizes = [1, 8, 64], strides = [1, 1, 1]} : vector<16x8x64xf32> to vector<1x8x64xf32>
    %21 = vector.extract_strided_slice %10 {offsets = [0, 0, 0], sizes = [15, 8, 64], strides = [1, 1, 1]} : vector<16x8x64xf32> to vector<15x8x64xf32>
    %22 = tpu.concatenate %20, %21 in 0 : vector<1x8x64xf32>, vector<15x8x64xf32> -> vector<16x8x64xf32>
    %c0_6 = arith.constant 0 : index
    %c0_7 = arith.constant 0 : index
    %23 = vector.load %arg2[%c0_6, %c0_7] : memref<9x64xf32, #tpu.memory_space<vmem>>, vector<1x64xf32>
    %24 = vector.shape_cast %23 : vector<1x64xf32> to vector<64xf32>
    %25 = vector.shape_cast %24 : vector<64xf32> to vector<1x1x64xf32>
    %c-1_i32_8 = arith.constant -1 : i32
    %26 = vector.broadcast %c-1_i32_8 : i32 to vector<16x8x1xi32>
    %27 = arith.addi %3, %26 : vector<16x8x1xi32>
    %c0_i32_9 = arith.constant 0 : i32
    %28 = vector.broadcast %c0_i32_9 : i32 to vector<16x8x1xi32>
    %29 = arith.cmpi sge, %27, %28 : vector<16x8x1xi32>
    %c-1_i32_10 = arith.constant -1 : i32
    %30 = vector.broadcast %c-1_i32_10 : i32 to vector<16x8x1xi32>
    %31 = arith.addi %3, %30 : vector<16x8x1xi32>
    %c8_i32_11 = arith.constant 8 : i32
    %32 = vector.broadcast %c8_i32_11 : i32 to vector<16x8x1xi32>
    %33 = arith.cmpi slt, %31, %32 : vector<16x8x1xi32>
    %34 = arith.andi %29, %33 : vector<16x8x1xi1>
    %35 = arith.andi %19, %34 : vector<16x8x1xi1>
    %cst = arith.constant 0.000000e+00 : f32
    %36 = vector.shape_cast %35 : vector<16x8x1xi1> to vector<16x8x1xi1>
    %37 = vector.broadcast %36 : vector<16x8x1xi1> to vector<16x8x64xi1>
    %38 = vector.broadcast %cst : f32 to vector<16x8x64xf32>
    %39 = arith.select %37, %22, %38 : vector<16x8x64xi1>, vector<16x8x64xf32>
    %40 = vector.broadcast %25 : vector<1x1x64xf32> to vector<16x8x64xf32>
    %41 = arith.mulf %39, %40 : vector<16x8x64xf32>
    %42 = arith.addf %9, %41 : vector<16x8x64xf32>
    %c3 = arith.constant 3 : index
    %c0_12 = arith.constant 0 : index
    %43 = vector.load %arg2[%c3, %c0_12] : memref<9x64xf32, #tpu.memory_space<vmem>>, vector<1x64xf32>
    %44 = vector.shape_cast %43 : vector<1x64xf32> to vector<64xf32>
    %45 = vector.shape_cast %44 : vector<64xf32> to vector<1x1x64xf32>
    %c0_i32_13 = arith.constant 0 : i32
    %46 = vector.broadcast %c0_i32_13 : i32 to vector<16x8x1xi32>
    %47 = arith.addi %3, %46 : vector<16x8x1xi32>
    %c0_i32_14 = arith.constant 0 : i32
    %48 = vector.broadcast %c0_i32_14 : i32 to vector<16x8x1xi32>
    %49 = arith.cmpi sge, %47, %48 : vector<16x8x1xi32>
    %c0_i32_15 = arith.constant 0 : i32
    %50 = vector.broadcast %c0_i32_15 : i32 to vector<16x8x1xi32>
    %51 = arith.addi %3, %50 : vector<16x8x1xi32>
    %c8_i32_16 = arith.constant 8 : i32
    %52 = vector.broadcast %c8_i32_16 : i32 to vector<16x8x1xi32>
    %53 = arith.cmpi slt, %51, %52 : vector<16x8x1xi32>
    %54 = arith.andi %49, %53 : vector<16x8x1xi1>
    %55 = arith.andi %19, %54 : vector<16x8x1xi1>
    %cst_17 = arith.constant 0.000000e+00 : f32
    %56 = vector.shape_cast %55 : vector<16x8x1xi1> to vector<16x8x1xi1>
    %57 = vector.broadcast %56 : vector<16x8x1xi1> to vector<16x8x64xi1>
    %58 = vector.broadcast %cst_17 : f32 to vector<16x8x64xf32>
    %59 = arith.select %57, %10, %58 : vector<16x8x64xi1>, vector<16x8x64xf32>
    %60 = vector.broadcast %45 : vector<1x1x64xf32> to vector<16x8x64xf32>
    %61 = arith.mulf %59, %60 : vector<16x8x64xf32>
    %62 = arith.addf %42, %61 : vector<16x8x64xf32>
    %63 = vector.extract_strided_slice %10 {offsets = [1, 0, 0], sizes = [15, 8, 64], strides = [1, 1, 1]} : vector<16x8x64xf32> to vector<15x8x64xf32>
    %64 = vector.extract_strided_slice %10 {offsets = [15, 0, 0], sizes = [1, 8, 64], strides = [1, 1, 1]} : vector<16x8x64xf32> to vector<1x8x64xf32>
    %65 = tpu.concatenate %63, %64 in 0 : vector<15x8x64xf32>, vector<1x8x64xf32> -> vector<16x8x64xf32>
    %c6 = arith.constant 6 : index
    %c0_18 = arith.constant 0 : index
    %66 = vector.load %arg2[%c6, %c0_18] : memref<9x64xf32, #tpu.memory_space<vmem>>, vector<1x64xf32>
    %67 = vector.shape_cast %66 : vector<1x64xf32> to vector<64xf32>
    %68 = vector.shape_cast %67 : vector<64xf32> to vector<1x1x64xf32>
    %c1_i32_19 = arith.constant 1 : i32
    %69 = vector.broadcast %c1_i32_19 : i32 to vector<16x8x1xi32>
    %70 = arith.addi %3, %69 : vector<16x8x1xi32>
    %c0_i32_20 = arith.constant 0 : i32
    %71 = vector.broadcast %c0_i32_20 : i32 to vector<16x8x1xi32>
    %72 = arith.cmpi sge, %70, %71 : vector<16x8x1xi32>
    %c1_i32_21 = arith.constant 1 : i32
    %73 = vector.broadcast %c1_i32_21 : i32 to vector<16x8x1xi32>
    %74 = arith.addi %3, %73 : vector<16x8x1xi32>
    %c8_i32_22 = arith.constant 8 : i32
    %75 = vector.broadcast %c8_i32_22 : i32 to vector<16x8x1xi32>
    %76 = arith.cmpi slt, %74, %75 : vector<16x8x1xi32>
    %77 = arith.andi %72, %76 : vector<16x8x1xi1>
    %78 = arith.andi %19, %77 : vector<16x8x1xi1>
    %cst_23 = arith.constant 0.000000e+00 : f32
    %79 = vector.shape_cast %78 : vector<16x8x1xi1> to vector<16x8x1xi1>
    %80 = vector.broadcast %79 : vector<16x8x1xi1> to vector<16x8x64xi1>
    %81 = vector.broadcast %cst_23 : f32 to vector<16x8x64xf32>
    %82 = arith.select %80, %65, %81 : vector<16x8x64xi1>, vector<16x8x64xf32>
    %83 = vector.broadcast %68 : vector<1x1x64xf32> to vector<16x8x64xf32>
    %84 = arith.mulf %82, %83 : vector<16x8x64xf32>
    %85 = arith.addf %62, %84 : vector<16x8x64xf32>
    %c0_i32_24 = arith.constant 0 : i32
    %86 = vector.broadcast %c0_i32_24 : i32 to vector<16x8x1xi32>
    %87 = arith.addi %5, %86 : vector<16x8x1xi32>
    %c0_i32_25 = arith.constant 0 : i32
    %88 = vector.broadcast %c0_i32_25 : i32 to vector<16x8x1xi32>
    %89 = arith.cmpi sge, %87, %88 : vector<16x8x1xi32>
    %c0_i32_26 = arith.constant 0 : i32
    %90 = vector.broadcast %c0_i32_26 : i32 to vector<16x8x1xi32>
    %91 = arith.addi %5, %90 : vector<16x8x1xi32>
    %c8_i32_27 = arith.constant 8 : i32
    %92 = vector.broadcast %c8_i32_27 : i32 to vector<16x8x1xi32>
    %93 = arith.cmpi slt, %91, %92 : vector<16x8x1xi32>
    %94 = arith.andi %89, %93 : vector<16x8x1xi1>
    %95 = vector.extract_strided_slice %1 {offsets = [0, 0, 0], sizes = [1, 8, 64], strides = [1, 1, 1]} : vector<16x8x64xf32> to vector<1x8x64xf32>
    %96 = vector.extract_strided_slice %1 {offsets = [0, 0, 0], sizes = [15, 8, 64], strides = [1, 1, 1]} : vector<16x8x64xf32> to vector<15x8x64xf32>
    %97 = tpu.concatenate %95, %96 in 0 : vector<1x8x64xf32>, vector<15x8x64xf32> -> vector<16x8x64xf32>
    %c1 = arith.constant 1 : index
    %c0_28 = arith.constant 0 : index
    %98 = vector.load %arg2[%c1, %c0_28] : memref<9x64xf32, #tpu.memory_space<vmem>>, vector<1x64xf32>
    %99 = vector.shape_cast %98 : vector<1x64xf32> to vector<64xf32>
    %100 = vector.shape_cast %99 : vector<64xf32> to vector<1x1x64xf32>
    %c-1_i32_29 = arith.constant -1 : i32
    %101 = vector.broadcast %c-1_i32_29 : i32 to vector<16x8x1xi32>
    %102 = arith.addi %3, %101 : vector<16x8x1xi32>
    %c0_i32_30 = arith.constant 0 : i32
    %103 = vector.broadcast %c0_i32_30 : i32 to vector<16x8x1xi32>
    %104 = arith.cmpi sge, %102, %103 : vector<16x8x1xi32>
    %c-1_i32_31 = arith.constant -1 : i32
    %105 = vector.broadcast %c-1_i32_31 : i32 to vector<16x8x1xi32>
    %106 = arith.addi %3, %105 : vector<16x8x1xi32>
    %c8_i32_32 = arith.constant 8 : i32
    %107 = vector.broadcast %c8_i32_32 : i32 to vector<16x8x1xi32>
    %108 = arith.cmpi slt, %106, %107 : vector<16x8x1xi32>
    %109 = arith.andi %104, %108 : vector<16x8x1xi1>
    %110 = arith.andi %94, %109 : vector<16x8x1xi1>
    %cst_33 = arith.constant 0.000000e+00 : f32
    %111 = vector.shape_cast %110 : vector<16x8x1xi1> to vector<16x8x1xi1>
    %112 = vector.broadcast %111 : vector<16x8x1xi1> to vector<16x8x64xi1>
    %113 = vector.broadcast %cst_33 : f32 to vector<16x8x64xf32>
    %114 = arith.select %112, %97, %113 : vector<16x8x64xi1>, vector<16x8x64xf32>
    %115 = vector.broadcast %100 : vector<1x1x64xf32> to vector<16x8x64xf32>
    %116 = arith.mulf %114, %115 : vector<16x8x64xf32>
    %117 = arith.addf %85, %116 : vector<16x8x64xf32>
    %c4 = arith.constant 4 : index
    %c0_34 = arith.constant 0 : index
    %118 = vector.load %arg2[%c4, %c0_34] : memref<9x64xf32, #tpu.memory_space<vmem>>, vector<1x64xf32>
    %119 = vector.shape_cast %118 : vector<1x64xf32> to vector<64xf32>
    %120 = vector.shape_cast %119 : vector<64xf32> to vector<1x1x64xf32>
    %121 = vector.broadcast %120 : vector<1x1x64xf32> to vector<16x8x64xf32>
    %122 = arith.mulf %1, %121 : vector<16x8x64xf32>
    %123 = arith.addf %117, %122 : vector<16x8x64xf32>
    %124 = vector.extract_strided_slice %1 {offsets = [1, 0, 0], sizes = [15, 8, 64], strides = [1, 1, 1]} : vector<16x8x64xf32> to vector<15x8x64xf32>
    %125 = vector.extract_strided_slice %1 {offsets = [15, 0, 0], sizes = [1, 8, 64], strides = [1, 1, 1]} : vector<16x8x64xf32> to vector<1x8x64xf32>
    %126 = tpu.concatenate %124, %125 in 0 : vector<15x8x64xf32>, vector<1x8x64xf32> -> vector<16x8x64xf32>
    %c7 = arith.constant 7 : index
    %c0_35 = arith.constant 0 : index
    %127 = vector.load %arg2[%c7, %c0_35] : memref<9x64xf32, #tpu.memory_space<vmem>>, vector<1x64xf32>
    %128 = vector.shape_cast %127 : vector<1x64xf32> to vector<64xf32>
    %129 = vector.shape_cast %128 : vector<64xf32> to vector<1x1x64xf32>
    %c1_i32_36 = arith.constant 1 : i32
    %130 = vector.broadcast %c1_i32_36 : i32 to vector<16x8x1xi32>
    %131 = arith.addi %3, %130 : vector<16x8x1xi32>
    %c0_i32_37 = arith.constant 0 : i32
    %132 = vector.broadcast %c0_i32_37 : i32 to vector<16x8x1xi32>
    %133 = arith.cmpi sge, %131, %132 : vector<16x8x1xi32>
    %c1_i32_38 = arith.constant 1 : i32
    %134 = vector.broadcast %c1_i32_38 : i32 to vector<16x8x1xi32>
    %135 = arith.addi %3, %134 : vector<16x8x1xi32>
    %c8_i32_39 = arith.constant 8 : i32
    %136 = vector.broadcast %c8_i32_39 : i32 to vector<16x8x1xi32>
    %137 = arith.cmpi slt, %135, %136 : vector<16x8x1xi32>
    %138 = arith.andi %133, %137 : vector<16x8x1xi1>
    %139 = arith.andi %94, %138 : vector<16x8x1xi1>
    %cst_40 = arith.constant 0.000000e+00 : f32
    %140 = vector.shape_cast %139 : vector<16x8x1xi1> to vector<16x8x1xi1>
    %141 = vector.broadcast %140 : vector<16x8x1xi1> to vector<16x8x64xi1>
    %142 = vector.broadcast %cst_40 : f32 to vector<16x8x64xf32>
    %143 = arith.select %141, %126, %142 : vector<16x8x64xi1>, vector<16x8x64xf32>
    %144 = vector.broadcast %129 : vector<1x1x64xf32> to vector<16x8x64xf32>
    %145 = arith.mulf %143, %144 : vector<16x8x64xf32>
    %146 = arith.addf %123, %145 : vector<16x8x64xf32>
    %c7_i32 = arith.constant 7 : i32
    %147 = tpu.dynamic_rotate %1 by %c7_i32 dim 1 : vector<16x8x64xf32>, i32 -> vector<16x8x64xf32>
    %c1_i32_41 = arith.constant 1 : i32
    %148 = vector.broadcast %c1_i32_41 : i32 to vector<16x8x1xi32>
    %149 = arith.addi %5, %148 : vector<16x8x1xi32>
    %c0_i32_42 = arith.constant 0 : i32
    %150 = vector.broadcast %c0_i32_42 : i32 to vector<16x8x1xi32>
    %151 = arith.cmpi sge, %149, %150 : vector<16x8x1xi32>
    %c1_i32_43 = arith.constant 1 : i32
    %152 = vector.broadcast %c1_i32_43 : i32 to vector<16x8x1xi32>
    %153 = arith.addi %5, %152 : vector<16x8x1xi32>
    %c8_i32_44 = arith.constant 8 : i32
    %154 = vector.broadcast %c8_i32_44 : i32 to vector<16x8x1xi32>
    %155 = arith.cmpi slt, %153, %154 : vector<16x8x1xi32>
    %156 = arith.andi %151, %155 : vector<16x8x1xi1>
    %157 = vector.extract_strided_slice %147 {offsets = [0, 0, 0], sizes = [1, 8, 64], strides = [1, 1, 1]} : vector<16x8x64xf32> to vector<1x8x64xf32>
    %158 = vector.extract_strided_slice %147 {offsets = [0, 0, 0], sizes = [15, 8, 64], strides = [1, 1, 1]} : vector<16x8x64xf32> to vector<15x8x64xf32>
    %159 = tpu.concatenate %157, %158 in 0 : vector<1x8x64xf32>, vector<15x8x64xf32> -> vector<16x8x64xf32>
    %c2 = arith.constant 2 : index
    %c0_45 = arith.constant 0 : index
    %160 = vector.load %arg2[%c2, %c0_45] : memref<9x64xf32, #tpu.memory_space<vmem>>, vector<1x64xf32>
    %161 = vector.shape_cast %160 : vector<1x64xf32> to vector<64xf32>
    %162 = vector.shape_cast %161 : vector<64xf32> to vector<1x1x64xf32>
    %c-1_i32_46 = arith.constant -1 : i32
    %163 = vector.broadcast %c-1_i32_46 : i32 to vector<16x8x1xi32>
    %164 = arith.addi %3, %163 : vector<16x8x1xi32>
    %c0_i32_47 = arith.constant 0 : i32
    %165 = vector.broadcast %c0_i32_47 : i32 to vector<16x8x1xi32>
    %166 = arith.cmpi sge, %164, %165 : vector<16x8x1xi32>
    %c-1_i32_48 = arith.constant -1 : i32
    %167 = vector.broadcast %c-1_i32_48 : i32 to vector<16x8x1xi32>
    %168 = arith.addi %3, %167 : vector<16x8x1xi32>
    %c8_i32_49 = arith.constant 8 : i32
    %169 = vector.broadcast %c8_i32_49 : i32 to vector<16x8x1xi32>
    %170 = arith.cmpi slt, %168, %169 : vector<16x8x1xi32>
    %171 = arith.andi %166, %170 : vector<16x8x1xi1>
    %172 = arith.andi %156, %171 : vector<16x8x1xi1>
    %cst_50 = arith.constant 0.000000e+00 : f32
    %173 = vector.shape_cast %172 : vector<16x8x1xi1> to vector<16x8x1xi1>
    %174 = vector.broadcast %173 : vector<16x8x1xi1> to vector<16x8x64xi1>
    %175 = vector.broadcast %cst_50 : f32 to vector<16x8x64xf32>
    %176 = arith.select %174, %159, %175 : vector<16x8x64xi1>, vector<16x8x64xf32>
    %177 = vector.broadcast %162 : vector<1x1x64xf32> to vector<16x8x64xf32>
    %178 = arith.mulf %176, %177 : vector<16x8x64xf32>
    %179 = arith.addf %146, %178 : vector<16x8x64xf32>
    %c5 = arith.constant 5 : index
    %c0_51 = arith.constant 0 : index
    %180 = vector.load %arg2[%c5, %c0_51] : memref<9x64xf32, #tpu.memory_space<vmem>>, vector<1x64xf32>
    %181 = vector.shape_cast %180 : vector<1x64xf32> to vector<64xf32>
    %182 = vector.shape_cast %181 : vector<64xf32> to vector<1x1x64xf32>
    %c0_i32_52 = arith.constant 0 : i32
    %183 = vector.broadcast %c0_i32_52 : i32 to vector<16x8x1xi32>
    %184 = arith.addi %3, %183 : vector<16x8x1xi32>
    %c0_i32_53 = arith.constant 0 : i32
    %185 = vector.broadcast %c0_i32_53 : i32 to vector<16x8x1xi32>
    %186 = arith.cmpi sge, %184, %185 : vector<16x8x1xi32>
    %c0_i32_54 = arith.constant 0 : i32
    %187 = vector.broadcast %c0_i32_54 : i32 to vector<16x8x1xi32>
    %188 = arith.addi %3, %187 : vector<16x8x1xi32>
    %c8_i32_55 = arith.constant 8 : i32
    %189 = vector.broadcast %c8_i32_55 : i32 to vector<16x8x1xi32>
    %190 = arith.cmpi slt, %188, %189 : vector<16x8x1xi32>
    %191 = arith.andi %186, %190 : vector<16x8x1xi1>
    %192 = arith.andi %156, %191 : vector<16x8x1xi1>
    %cst_56 = arith.constant 0.000000e+00 : f32
    %193 = vector.shape_cast %192 : vector<16x8x1xi1> to vector<16x8x1xi1>
    %194 = vector.broadcast %193 : vector<16x8x1xi1> to vector<16x8x64xi1>
    %195 = vector.broadcast %cst_56 : f32 to vector<16x8x64xf32>
    %196 = arith.select %194, %147, %195 : vector<16x8x64xi1>, vector<16x8x64xf32>
    %197 = vector.broadcast %182 : vector<1x1x64xf32> to vector<16x8x64xf32>
    %198 = arith.mulf %196, %197 : vector<16x8x64xf32>
    %199 = arith.addf %179, %198 : vector<16x8x64xf32>
    %200 = vector.extract_strided_slice %147 {offsets = [1, 0, 0], sizes = [15, 8, 64], strides = [1, 1, 1]} : vector<16x8x64xf32> to vector<15x8x64xf32>
    %201 = vector.extract_strided_slice %147 {offsets = [15, 0, 0], sizes = [1, 8, 64], strides = [1, 1, 1]} : vector<16x8x64xf32> to vector<1x8x64xf32>
    %202 = tpu.concatenate %200, %201 in 0 : vector<15x8x64xf32>, vector<1x8x64xf32> -> vector<16x8x64xf32>
    %c8 = arith.constant 8 : index
    %c0_57 = arith.constant 0 : index
    %203 = vector.load %arg2[%c8, %c0_57] : memref<9x64xf32, #tpu.memory_space<vmem>>, vector<1x64xf32>
    %204 = vector.shape_cast %203 : vector<1x64xf32> to vector<64xf32>
    %205 = vector.shape_cast %204 : vector<64xf32> to vector<1x1x64xf32>
    %c1_i32_58 = arith.constant 1 : i32
    %206 = vector.broadcast %c1_i32_58 : i32 to vector<16x8x1xi32>
    %207 = arith.addi %3, %206 : vector<16x8x1xi32>
    %c0_i32_59 = arith.constant 0 : i32
    %208 = vector.broadcast %c0_i32_59 : i32 to vector<16x8x1xi32>
    %209 = arith.cmpi sge, %207, %208 : vector<16x8x1xi32>
    %c1_i32_60 = arith.constant 1 : i32
    %210 = vector.broadcast %c1_i32_60 : i32 to vector<16x8x1xi32>
    %211 = arith.addi %3, %210 : vector<16x8x1xi32>
    %c8_i32_61 = arith.constant 8 : i32
    %212 = vector.broadcast %c8_i32_61 : i32 to vector<16x8x1xi32>
    %213 = arith.cmpi slt, %211, %212 : vector<16x8x1xi32>
    %214 = arith.andi %209, %213 : vector<16x8x1xi1>
    %215 = arith.andi %156, %214 : vector<16x8x1xi1>
    %cst_62 = arith.constant 0.000000e+00 : f32
    %216 = vector.shape_cast %215 : vector<16x8x1xi1> to vector<16x8x1xi1>
    %217 = vector.broadcast %216 : vector<16x8x1xi1> to vector<16x8x64xi1>
    %218 = vector.broadcast %cst_62 : f32 to vector<16x8x64xf32>
    %219 = arith.select %217, %202, %218 : vector<16x8x64xi1>, vector<16x8x64xf32>
    %220 = vector.broadcast %205 : vector<1x1x64xf32> to vector<16x8x64xf32>
    %221 = arith.mulf %219, %220 : vector<16x8x64xf32>
    %222 = arith.addf %199, %221 : vector<16x8x64xf32>
    %223 = vector.shape_cast %222 : vector<16x8x64xf32> to vector<128x64xf32>
    %224 = tpu.iota {dimensions = array<i32: 1>} : vector<1x64xi32>
    %c32_i32 = arith.constant 32 : i32
    %225 = vector.broadcast %c32_i32 : i32 to vector<1x64xi32>
    %226 = arith.cmpi slt, %224, %225 : vector<1x64xi32>
    %cst_63 = arith.constant 0.000000e+00 : f32
    %227 = vector.shape_cast %226 : vector<1x64xi1> to vector<1x64xi1>
    %228 = vector.broadcast %227 : vector<1x64xi1> to vector<128x64xi1>
    %229 = vector.broadcast %cst_63 : f32 to vector<128x64xf32>
    %230 = arith.select %228, %223, %229 : vector<128x64xi1>, vector<128x64xf32>
    %231 = vector.shape_cast %230 : vector<128x64xf32> to vector<2x64x64xf32>
    %232 = vector.shape_cast %223 : vector<128x64xf32> to vector<2x64x64xf32>
    %cst_64 = arith.constant dense<0.000000e+00> : vector<2x64xf32>
    %233 = vector.multi_reduction <add>, %231, %cst_64 [2] : vector<2x64x64xf32> to vector<2x64xf32>
    %234 = vector.shape_cast %233 : vector<2x64xf32> to vector<2x64x1xf32>
    %cst_65 = arith.constant dense<0.000000e+00> : vector<2x1xf32>
    %235 = vector.multi_reduction <add>, %234, %cst_65 [1] : vector<2x64x1xf32> to vector<2x1xf32>
    %236 = vector.shape_cast %235 : vector<2x1xf32> to vector<2x1x1xf32>
    %237 = arith.mulf %231, %231 : vector<2x64x64xf32>
    %cst_66 = arith.constant dense<0.000000e+00> : vector<2x64xf32>
    %238 = vector.multi_reduction <add>, %237, %cst_66 [2] : vector<2x64x64xf32> to vector<2x64xf32>
    %239 = vector.shape_cast %238 : vector<2x64xf32> to vector<2x64x1xf32>
    %cst_67 = arith.constant dense<0.000000e+00> : vector<2x1xf32>
    %240 = vector.multi_reduction <add>, %239, %cst_67 [1] : vector<2x64x1xf32> to vector<2x1xf32>
    %241 = vector.shape_cast %240 : vector<2x1xf32> to vector<2x1x1xf32>
    %cst_68 = arith.constant 2.048000e+03 : f32
    %242 = vector.broadcast %cst_68 : f32 to vector<2x1x1xf32>
    %243 = arith.divf %236, %242 : vector<2x1x1xf32>
    %cst_69 = arith.constant 2.048000e+03 : f32
    %244 = vector.broadcast %cst_69 : f32 to vector<2x1x1xf32>
    %245 = arith.divf %241, %244 : vector<2x1x1xf32>
    %246 = arith.mulf %243, %243 : vector<2x1x1xf32>
    %247 = arith.subf %245, %246 : vector<2x1x1xf32>
    %248 = vector.broadcast %243 : vector<2x1x1xf32> to vector<2x64x64xf32>
    %249 = arith.subf %232, %248 : vector<2x64x64xf32>
    %cst_70 = arith.constant 9.99999974E-6 : f32
    %250 = vector.broadcast %cst_70 : f32 to vector<2x1x1xf32>
    %251 = arith.addf %247, %250 : vector<2x1x1xf32>
    %252 = math.rsqrt %251 : vector<2x1x1xf32>
    %253 = vector.broadcast %252 : vector<2x1x1xf32> to vector<2x64x64xf32>
    %254 = arith.mulf %249, %253 : vector<2x64x64xf32>
    %c0_71 = arith.constant 0 : index
    %c0_72 = arith.constant 0 : index
    %255 = vector.load %arg4[%c0_71, %c0_72] : memref<1x64xf32, #tpu.memory_space<vmem>>, vector<1x64xf32>
    %256 = vector.shape_cast %255 : vector<1x64xf32> to vector<1x1x64xf32>
    %257 = vector.broadcast %256 : vector<1x1x64xf32> to vector<2x64x64xf32>
    %258 = arith.mulf %254, %257 : vector<2x64x64xf32>
    %c0_73 = arith.constant 0 : index
    %c0_74 = arith.constant 0 : index
    %259 = vector.load %arg5[%c0_73, %c0_74] : memref<1x64xf32, #tpu.memory_space<vmem>>, vector<1x64xf32>
    %260 = vector.shape_cast %259 : vector<1x64xf32> to vector<1x1x64xf32>
    %261 = vector.broadcast %260 : vector<1x1x64xf32> to vector<2x64x64xf32>
    %262 = arith.addf %258, %261 : vector<2x64x64xf32>
    %263 = vector.shape_cast %262 : vector<2x64x64xf32> to vector<128x64xf32>
    %264 = arith.truncf %263 : vector<128x64xf32> to vector<128x64xbf16>
    %c0_75 = arith.constant 0 : index
    %c0_76 = arith.constant 0 : index
    %265 = vector.load %arg6[%c0_75, %c0_76] : memref<64x64xbf16, #tpu.memory_space<vmem>>, vector<64x64xbf16>
    %cst_77 = arith.constant dense<0.000000e+00> : vector<128x64xf32>
    %266 = tpu.matmul %264, %265, %cst_77 {dimension_numbers = #tpu.dot_dimension_numbers<[1], [0], [0], [1], [0, 0, 1, 1], [], []>} : vector<128x64xbf16>, vector<64x64xbf16>, vector<128x64xf32> -> vector<128x64xf32>
    %c0_78 = arith.constant 0 : index
    %c0_79 = arith.constant 0 : index
    %267 = vector.load %arg7[%c0_78, %c0_79] : memref<1x64xf32, #tpu.memory_space<vmem>>, vector<1x64xf32>
    %268 = vector.broadcast %267 : vector<1x64xf32> to vector<128x64xf32>
    %269 = arith.addf %266, %268 : vector<128x64xf32>
    %270 = vector.shape_cast %269 : vector<128x64xf32> to vector<2x64x64xf32>
    %271 = vector.extract_strided_slice %270 {offsets = [0, 0, 0], sizes = [2, 64, 16], strides = [1, 1, 1]} : vector<2x64x64xf32> to vector<2x64x16xf32>
    %272 = arith.truncf %271 : vector<2x64x16xf32> to vector<2x64x16xbf16>
    %273 = vector.extract_strided_slice %270 {offsets = [0, 0, 16], sizes = [2, 64, 16], strides = [1, 1, 1]} : vector<2x64x64xf32> to vector<2x64x16xf32>
    %274 = arith.truncf %273 : vector<2x64x16xf32> to vector<2x64x16xbf16>
    %275 = vector.extract_strided_slice %270 {offsets = [0, 0, 32], sizes = [2, 64, 32], strides = [1, 1, 1]} : vector<2x64x64xf32> to vector<2x64x32xf32>
    %276 = arith.truncf %275 : vector<2x64x32xf32> to vector<2x64x32xbf16>
    "tpu.trace_start"() <{level = 10 : i32, message = "bqd,bkd->bqk"}> : () -> ()
    %cst_80 = arith.constant dense<0.000000e+00> : vector<2x64x64xf32>
    %277 = tpu.matmul %272, %274, %cst_80 {dimension_numbers = #tpu.dot_dimension_numbers<[2], [2], [1], [1], [0, 0, 0, 1, 1, 1], [0], [0]>} : vector<2x64x16xbf16>, vector<2x64x16xbf16>, vector<2x64x64xf32> -> vector<2x64x64xf32>
    "tpu.trace_stop"() : () -> ()
    %cst_81 = arith.constant 2.500000e-01 : f32
    %278 = vector.broadcast %cst_81 : f32 to vector<2x64x64xf32>
    %279 = arith.mulf %277, %278 : vector<2x64x64xf32>
    %cst_82 = arith.constant dense<0xFF800000> : vector<2x64xf32>
    %280 = vector.multi_reduction <maximumf>, %279, %cst_82 [2] : vector<2x64x64xf32> to vector<2x64xf32>
    %281 = vector.shape_cast %280 : vector<2x64xf32> to vector<2x64x1xf32>
    %282 = vector.broadcast %281 : vector<2x64x1xf32> to vector<2x64x64xf32>
    %283 = arith.subf %279, %282 : vector<2x64x64xf32>
    %284 = math.exp %283 : vector<2x64x64xf32>
    %cst_83 = arith.constant dense<0.000000e+00> : vector<2x64xf32>
    %285 = vector.multi_reduction <add>, %284, %cst_83 [2] : vector<2x64x64xf32> to vector<2x64xf32>
    %286 = vector.shape_cast %285 : vector<2x64xf32> to vector<2x64x1xf32>
    %287 = tpu.reciprocal %286 {approx = true} : vector<2x64x1xf32> -> vector<2x64x1xf32>
    %288 = vector.broadcast %287 : vector<2x64x1xf32> to vector<2x64x64xf32>
    %289 = arith.mulf %284, %288 : vector<2x64x64xf32>
    %290 = arith.truncf %289 : vector<2x64x64xf32> to vector<2x64x64xbf16>
    "tpu.trace_start"() <{level = 10 : i32, message = "bqk,bkd->bqd"}> : () -> ()
    %cst_84 = arith.constant dense<0.000000e+00> : vector<2x64x32xf32>
    %291 = tpu.matmul %290, %276, %cst_84 {dimension_numbers = #tpu.dot_dimension_numbers<[2], [1], [1], [2], [0, 0, 0, 1, 1, 2], [0], [0]>} : vector<2x64x64xbf16>, vector<2x64x32xbf16>, vector<2x64x32xf32> -> vector<2x64x32xf32>
    "tpu.trace_stop"() : () -> ()
    %292 = vector.shape_cast %291 : vector<2x64x32xf32> to vector<128x32xf32>
    %cst_85 = arith.constant 0.000000e+00 : f32
    %293 = vector.broadcast %cst_85 : f32 to vector<128x32xf32>
    %294 = arith.maximumf %292, %293 : vector<128x32xf32>
    %295 = arith.truncf %294 : vector<128x32xf32> to vector<128x32xbf16>
    %c0_86 = arith.constant 0 : index
    %c0_87 = arith.constant 0 : index
    %296 = vector.load %arg8[%c0_86, %c0_87] : memref<32x64xbf16, #tpu.memory_space<vmem>>, vector<32x64xbf16>
    %cst_88 = arith.constant dense<0.000000e+00> : vector<128x64xf32>
    %297 = tpu.matmul %295, %296, %cst_88 {dimension_numbers = #tpu.dot_dimension_numbers<[1], [0], [0], [1], [0, 0, 1, 1], [], []>} : vector<128x32xbf16>, vector<32x64xbf16>, vector<128x64xf32> -> vector<128x64xf32>
    %cst_89 = arith.constant 0.000000e+00 : f32
    %298 = vector.broadcast %cst_89 : f32 to vector<128x64xf32>
    %299 = arith.maximumf %223, %298 : vector<128x64xf32>
    %300 = arith.truncf %299 : vector<128x64xf32> to vector<128x64xbf16>
    %c0_90 = arith.constant 0 : index
    %c0_91 = arith.constant 0 : index
    %301 = vector.load %arg9[%c0_90, %c0_91] : memref<64x64xbf16, #tpu.memory_space<vmem>>, vector<64x64xbf16>
    %cst_92 = arith.constant dense<0.000000e+00> : vector<128x64xf32>
    %302 = tpu.matmul %300, %301, %cst_92 {dimension_numbers = #tpu.dot_dimension_numbers<[1], [0], [0], [1], [0, 0, 1, 1], [], []>} : vector<128x64xbf16>, vector<64x64xbf16>, vector<128x64xf32> -> vector<128x64xf32>
    %303 = arith.addf %297, %302 : vector<128x64xf32>
    %c0_93 = arith.constant 0 : index
    %c0_94 = arith.constant 0 : index
    %304 = vector.load %arg10[%c0_93, %c0_94] : memref<1x64xf32, #tpu.memory_space<vmem>>, vector<1x64xf32>
    %305 = vector.broadcast %304 : vector<1x64xf32> to vector<128x64xf32>
    %306 = arith.addf %303, %305 : vector<128x64xf32>
    %307 = arith.addf %223, %306 : vector<128x64xf32>
    %308 = arith.truncf %307 : vector<128x64xf32> to vector<128x64xbf16>
    %c0_95 = arith.constant 0 : index
    %c0_96 = arith.constant 0 : index
    %309 = vector.load %arg11[%c0_95, %c0_96] : memref<64x128xbf16, #tpu.memory_space<vmem>>, vector<64x128xbf16>
    %cst_97 = arith.constant dense<0.000000e+00> : vector<128x128xf32>
    %310 = tpu.matmul %308, %309, %cst_97 {dimension_numbers = #tpu.dot_dimension_numbers<[1], [0], [0], [1], [0, 0, 1, 1], [], []>} : vector<128x64xbf16>, vector<64x128xbf16>, vector<128x128xf32> -> vector<128x128xf32>
    %c0_98 = arith.constant 0 : index
    %c0_99 = arith.constant 0 : index
    %311 = vector.load %arg12[%c0_98, %c0_99] : memref<1x128xf32, #tpu.memory_space<vmem>>, vector<1x128xf32>
    %312 = vector.broadcast %311 : vector<1x128xf32> to vector<128x128xf32>
    %313 = arith.addf %310, %312 : vector<128x128xf32>
    %cst_100 = arith.constant 0.000000e+00 : f32
    %314 = vector.broadcast %cst_100 : f32 to vector<128x128xf32>
    %315 = arith.maximumf %313, %314 : vector<128x128xf32>
    %316 = arith.truncf %315 : vector<128x128xf32> to vector<128x128xbf16>
    %c0_101 = arith.constant 0 : index
    %c0_102 = arith.constant 0 : index
    %317 = vector.load %arg13[%c0_101, %c0_102] : memref<128x64xbf16, #tpu.memory_space<vmem>>, vector<128x64xbf16>
    %cst_103 = arith.constant dense<0.000000e+00> : vector<128x64xf32>
    %318 = tpu.matmul %316, %317, %cst_103 {dimension_numbers = #tpu.dot_dimension_numbers<[1], [0], [0], [1], [0, 0, 1, 1], [], []>} : vector<128x128xbf16>, vector<128x64xbf16>, vector<128x64xf32> -> vector<128x64xf32>
    %c0_104 = arith.constant 0 : index
    %c0_105 = arith.constant 0 : index
    %319 = vector.load %arg14[%c0_104, %c0_105] : memref<1x64xf32, #tpu.memory_space<vmem>>, vector<1x64xf32>
    %320 = vector.broadcast %319 : vector<1x64xf32> to vector<128x64xf32>
    %321 = arith.addf %318, %320 : vector<128x64xf32>
    %322 = arith.addf %307, %321 : vector<128x64xf32>
    %323 = vector.shape_cast %322 : vector<128x64xf32> to vector<2x64x64xf32>
    %c0_106 = arith.constant 0 : index
    %c0_107 = arith.constant 0 : index
    %c0_108 = arith.constant 0 : index
    %324 = vector.load %arg15[%c0_106, %c0_107, %c0_108] : memref<2x64x64xf32, #tpu.memory_space<vmem>>, vector<2x64x64xf32>
    tpu.vector_store %arg15[%c0_106, %c0_107, %c0_108], %323 {strides = array<i32>} : memref<2x64x64xf32, #tpu.memory_space<vmem>>, vector<2x64x64xf32>,
    return
  }
  func.func @transform_0(%arg0: i32) -> (i32, i32, i32, i32) {
    %c0_i32 = arith.constant 0 : i32
    %c0_i32_0 = arith.constant 0 : i32
    %c0_i32_1 = arith.constant 0 : i32
    %c0_i32_2 = arith.constant 0 : i32
    return %arg0, %c0_i32, %c0_i32_0, %c0_i32_1 : i32, i32, i32, i32
  }
  func.func @transform_1(%arg0: i32) -> (i32, i32) {
    %c0_i32 = arith.constant 0 : i32
    %c0_i32_0 = arith.constant 0 : i32
    %c0_i32_1 = arith.constant 0 : i32
    return %c0_i32, %c0_i32_0 : i32, i32
  }
  func.func @transform_2(%arg0: i32) -> (i32, i32) {
    %c0_i32 = arith.constant 0 : i32
    %c0_i32_0 = arith.constant 0 : i32
    %c0_i32_1 = arith.constant 0 : i32
    return %c0_i32, %c0_i32_0 : i32, i32
  }
  func.func @transform_3(%arg0: i32) -> (i32, i32) {
    %c0_i32 = arith.constant 0 : i32
    %c0_i32_0 = arith.constant 0 : i32
    %c0_i32_1 = arith.constant 0 : i32
    return %c0_i32, %c0_i32_0 : i32, i32
  }
  func.func @transform_4(%arg0: i32) -> (i32, i32) {
    %c0_i32 = arith.constant 0 : i32
    %c0_i32_0 = arith.constant 0 : i32
    %c0_i32_1 = arith.constant 0 : i32
    return %c0_i32, %c0_i32_0 : i32, i32
  }
  func.func @transform_5(%arg0: i32) -> (i32, i32) {
    %c0_i32 = arith.constant 0 : i32
    %c0_i32_0 = arith.constant 0 : i32
    %c0_i32_1 = arith.constant 0 : i32
    return %c0_i32, %c0_i32_0 : i32, i32
  }
  func.func @transform_6(%arg0: i32) -> (i32, i32) {
    %c0_i32 = arith.constant 0 : i32
    %c0_i32_0 = arith.constant 0 : i32
    %c0_i32_1 = arith.constant 0 : i32
    return %c0_i32, %c0_i32_0 : i32, i32
  }
  func.func @transform_7(%arg0: i32) -> (i32, i32) {
    %c0_i32 = arith.constant 0 : i32
    %c0_i32_0 = arith.constant 0 : i32
    %c0_i32_1 = arith.constant 0 : i32
    return %c0_i32, %c0_i32_0 : i32, i32
  }
  func.func @transform_8(%arg0: i32) -> (i32, i32) {
    %c0_i32 = arith.constant 0 : i32
    %c0_i32_0 = arith.constant 0 : i32
    %c0_i32_1 = arith.constant 0 : i32
    return %c0_i32, %c0_i32_0 : i32, i32
  }
  func.func @transform_9(%arg0: i32) -> (i32, i32) {
    %c0_i32 = arith.constant 0 : i32
    %c0_i32_0 = arith.constant 0 : i32
    %c0_i32_1 = arith.constant 0 : i32
    return %c0_i32, %c0_i32_0 : i32, i32
  }
  func.func @transform_10(%arg0: i32) -> (i32, i32) {
    %c0_i32 = arith.constant 0 : i32
    %c0_i32_0 = arith.constant 0 : i32
    %c0_i32_1 = arith.constant 0 : i32
    return %c0_i32, %c0_i32_0 : i32, i32
  }
  func.func @transform_11(%arg0: i32) -> (i32, i32) {
    %c0_i32 = arith.constant 0 : i32
    %c0_i32_0 = arith.constant 0 : i32
    %c0_i32_1 = arith.constant 0 : i32
    return %c0_i32, %c0_i32_0 : i32, i32
  }
  func.func @transform_12(%arg0: i32) -> (i32, i32) {
    %c0_i32 = arith.constant 0 : i32
    %c0_i32_0 = arith.constant 0 : i32
    %c0_i32_1 = arith.constant 0 : i32
    return %c0_i32, %c0_i32_0 : i32, i32
  }
  func.func @transform_13(%arg0: i32) -> (i32, i32) {
    %c0_i32 = arith.constant 0 : i32
    %c0_i32_0 = arith.constant 0 : i32
    %c0_i32_1 = arith.constant 0 : i32
    return %c0_i32, %c0_i32_0 : i32, i32
  }
  func.func @transform_14(%arg0: i32) -> (i32, i32, i32) {
    %c0_i32 = arith.constant 0 : i32
    %c0_i32_0 = arith.constant 0 : i32
    %c0_i32_1 = arith.constant 0 : i32
    return %arg0, %c0_i32, %c0_i32_0 : i32, i32, i32
  }
}

</mosaic_0001>

<bundles_post_ra>
// kernel: tpu_custom_call.1
= control target key start
LH: loop header
LB: loop body
LE: loop exit
PB: predicated region body
PF: predicated region fallthrough
CT: control target
= control target key end

     0   :  { %19 = vsyncpa [#allocation3], 0  ;;  %s4192_s0 = inlined_call_operand.hbm [shape: f32[2,8,8,64], index: 0, kind: input, shape index: {}]   ;;  %s4193_s1 = inlined_call_operand.hbm [shape: f32[9,64], index: 1, kind: input, shape index: {}]   ;;  %s4194_s2 = inlined_call_operand.vmem [shape: f32[1,64], index: 2, kind: input, shape index: {}]   ;;  %s4195_s3 = inlined_call_operand.vmem [shape: f32[1,64], index: 3, kind: input, shape index: {}]   ;;  %s4196_s4 = inlined_call_operand.vmem [shape: f32[1,64], index: 4, kind: input, shape index: {}]   ;;  %s4197_s5 = inlined_call_operand.vmem [shape: bf16[64,64], index: 5, kind: input, shape index: {}]   ;;  %s4198_s6 = inlined_call_operand.vmem [shape: f32[1,64], index: 6, kind: input, shape index: {}]   ;;  %s4199_s7 = inlined_call_operand.hbm [shape: bf16[32,64], index: 7, kind: input, shape index: {}]   ;;  %s4200_s8 = inlined_call_operand.vmem [shape: bf16[64,64], index: 8, kind: input, shape index: {}]   ;;  %s4201_s9 = inlined_call_operand.vmem [shape: f32[1,64], index: 9, kind: input, shape index: {}]   ;;  %s4202_s10 = inlined_call_operand.vmem [shape: bf16[64,128], index: 10, kind: input, shape index: {}]   ;;  %s4203_s11 = inlined_call_operand.vmem [shape: f32[1,128], index: 11, kind: input, shape index: {}]   ;;  %s4204_s12 = inlined_call_operand.vmem [shape: bf16[128,64], index: 12, kind: input, shape index: {}]   ;;  %s4205_s13 = inlined_call_operand.vmem [shape: f32[1,64], index: 13, kind: input, shape index: {}]   ;;  %s4206_s14 = inlined_call_operand.hbm [shape: f32[2,64,64], index: 14, kind: output, shape index: {}]  }
   0x1   :  { %20 = vsyncpa [#allocation6], 0 }
   0x2   :  { %21 = vsyncpa [#allocation4], 0  ;;  %s2969_s29 = smov [#allocation5]   ;;  %s2970_s15 = smov [#allocation2]  }
   0x3   :  { %s39_s30 = sshll.u32 %s2969_s29, 4  ;;  %s27_s16 = sshll.u32 %s2970_s15, 4  ;;  %s40_s30 = int_to_ptr.vmem [resolvable:$true] %s39_s30  ;;  %s28_s16 = int_to_ptr.vmem [resolvable:$true] %s27_s16 }
   0x4   :  { %s2891_s17 = scalar_lea.vmem %s40_s30, 256  ;;  %p2896_p1 = scmp.lt.s32.totalorder %s40_s30, %s40_s30 }
   0x5   :  { %p2892_p0 = scmp.ne.s32.totalorder %s40_s30, %s2891_s17  ;;  %p2897_p2 = scmp.lt.s32.totalorder %s2891_s17, %s2891_s17 }
   0x7   :  { %p2898_p3 = por %p2897_p2, %p2896_p1 }
   0x9   :  { %p2899_p4 = pnand %p2898_p3, %p2892_p0 }
   0xb   :  { %2902 = shalt.err (!%p2899_p4)
}
   0xc   :  { %s2971_s18 = smov 128   ;;  %s2972_s19 = smov 8  }
   0xd   :  { %45 = dma.hbm_to_vmem [thread:$0]  %s4193_s1, 256, %s40_s30, [#allocation6], %s2971_s18, %s2971_s18, %s2972_s19  }
   0xe   :  { %s2911_s22 = scalar_lea.vmem %s28_s16, 2048  ;;  %p2916_p6 = scmp.lt.s32.totalorder %s28_s16, %s28_s16 }
   0xf   :  { %p2912_p5 = scmp.ne.s32.totalorder %s28_s16, %s2911_s22  ;;  %p2917_p7 = scmp.lt.s32.totalorder %s2911_s22, %s2911_s22 }
  0x11   :  { %p2918_p8 = por %p2917_p7, %p2916_p6 }
  0x13   :  { %p2919_p9 = pnand %p2918_p8, %p2912_p5 }
  0x15   :  { %2922 = shalt.err (!%p2919_p9)
}
  0x16   :  { %33 = dma.hbm_to_vmem [thread:$0]  %s4192_s0, 2048, %s28_s16, [#allocation3], %s2971_s18, %s2971_s18, %s2972_s19  }
  0x17   :  { %s2973_s25 = smov [#allocation7]  }
  0x18   :  { %s61_s26 = sshll.u32 %s2973_s25, 4  ;;  %s62_s26 = int_to_ptr.vmem [resolvable:$true] %s61_s26 }
  0x19   :  { %s2931_s27 = scalar_lea.vmem %s62_s26, 256  ;;  %p2936_p11 = scmp.lt.s32.totalorder %s62_s26, %s62_s26 }
  0x1a   :  { %p2932_p10 = scmp.ne.s32.totalorder %s62_s26, %s2931_s27  ;;  %p2937_p12 = scmp.lt.s32.totalorder %s2931_s27, %s2931_s27 }
  0x1c   :  { %p2938_p13 = por %p2937_p12, %p2936_p11 }
  0x1e   :  { %p2939_p0 = pnand %p2938_p13, %p2932_p10 }
  0x20   :  { %2942 = shalt.err (!%p2939_p0)
}
  0x21   :  { %s2974_s1 = smov 64   ;;  %s2975_s28 = smov 4  }
  0x22   :  { %67 = dma.hbm_to_vmem [thread:$0]  %s4199_s7, 256, %s62_s26, [#allocation6], %s2974_s1, %s2974_s1, %s2975_s28  }
  0x23   :  { %2963 = dma.done.wait [#allocation3], 2048  }
  0x24   :  { %2964 = vsyncadd [#allocation3], 4294965248 }
  0x25   :  { %2965 = dma.done.wait [#allocation6], 512  }
  0x26   :  { %2966 = vsyncadd [#allocation6], 4294966784  ;;  %v106_v0 = vlaneseq  ;;  %v3073_v4 = vld [vmem:[#allocation2] sm:$0xff]  ;;  %v3075_v5 = vld [vmem:[#allocation2 + $0x8] sm:$0xff]  ;;  %vm590_vm3 = vcmask 523264   ;;  %vm1034_vm4 = vcmask 130048  }
  0x27   :  { %v3080_v6 = vld [vmem:[%s4194_s2] ss:$0 sm:$0xff]  ;;  %v115_v7 = vrot.slane %v3073_v4, 7  ;;  %v116_v8 = vrot.slane %v3075_v5, 7  ;;  %v3087_v10 = vld [vmem:[#allocation5 + $0x3] ss:$0 sm:$0xff] }
  0x28   :  { %v107_v1 = vshrl.u32 %v106_v0, 7  ;;  %v3085_v9 = vld [vmem:[#allocation5] ss:$0 sm:$0xff]  ;;  %v3090_v12 = vld [vmem:[#allocation5 + $0x6] ss:$0 sm:$0xff]  ;;  %v412_v17 = vrot.slane %v3073_v4, 1 }
  0x29   :  { %v162_v11 = vmul.f32 0.0, %v3085_v9  ;;  %v3092_v13 = vld [vmem:[#allocation5 + $0x1] ss:$0 sm:$0xff]  ;;  %v3100_v16 = vld [vmem:[#allocation5 + $0x4] ss:$0 sm:$0xff]  ;;  %v413_v22 = vrot.slane %v3075_v5, 1 }
  0x2a   :  { %v3069_v2 = vadd.s32 4294967295, %v107_v1  ;;  %v3071_v3 = vadd.s32 1, %v107_v1  ;;  %v3108_v21 = vld [vmem:[#allocation5 + $0x7] ss:$0 sm:$0xff]  ;;  %v3111_v23 = vld [vmem:[#allocation5 + $0x2] ss:$0 sm:$0xff]  ;;  %v339_v28 = vmul.f32 %v3100_v16, %v3073_v4  ;;  %v304_v52 = vmul.f32 %v3092_v13, %v3075_v5 }
  0x2b   :  { %v178_v18 = vadd.f32 %v3080_v6, %v162_v11  ;;  %v3113_v24 = vand.u32 127, %v106_v0  ;;  %v3115_v25 = vld [vmem:[#allocation2 + $0x10] sm:$0xff]  ;;  %v3118_v27 = vmul.f32 0.0, %v3092_v13  ;;  %v380_v29 = vmul.f32 %v3108_v21, %v3075_v5  ;;  %v3124_v30 = vld [vmem:[#allocation2 + $0x18] sm:$0xff]  ;;  %v3128_v32 = vld [vmem:[#allocation5 + $0x5] ss:$0 sm:$0xff] }
  0x2c   :  { %vm132_vm0 = vcmp.ge.s32.totalorder %v3069_v2, 0  ;;  %vm430_vm1 = vcmp.lt.s32.totalorder %v3071_v3, 8  ;;  %v117_v33 = vrot.slane %v3115_v25, 7  ;;  %v118_v34 = vrot.slane %v3124_v30, 7  ;;  %v3144_v40 = vld [vmem:[#allocation2 + $0x40] sm:$0xff]  ;;  %v3154_v45 = vld [vmem:[#allocation2 + $0x48] sm:$0xff] }
  0x2d   :  { %v143_v14 = vsel %vm132_vm0, %v115_v7, 0.0  ;;  %v3098_v15 = vsel %vm132_vm0, %v116_v8, 0.0  ;;  %v440_v31 = vsel %vm430_vm1, %v412_v17, 0.0  ;;  %v3136_v37 = vsel %vm430_vm1, %v413_v22, 0.0  ;;  %v3158_v48 = vld [vmem:[#allocation5 + $0x8] ss:$0 sm:$0xff] }
  0x2e   :  { %v201_v19 = vmul.f32 %v3087_v10, %v143_v14  ;;  %v240_v20 = vmul.f32 %v3090_v12, %v3098_v15  ;;  %v164_v35 = vmul.f32 %v3085_v9, %v3098_v15  ;;  %v3139_v38 = vmul.f32 0.0, %v3111_v23  ;;  %s2977_s27 = smov 96  }
  0x2f   :  { %v3142_v39 = vmul.f32 %v3111_v23, %v440_v31  ;;  %v145_v41 = vsel %vm132_vm0, %v117_v33, 0.0  ;;  %v3150_v42 = vsel %vm132_vm0, %v118_v34, 0.0  ;;  %v414_v44 = vrot.slane %v3115_v25, 1  ;;  %v3214_v34 = vld [vmem:[#allocation2 + $0x20] sm:$0xff] }
  0x30   :  { %v217_v26 = vadd.f32 %v201_v19, %v178_v18  ;;  %v180_v43 = vadd.f32 %v3080_v6, %v164_v35  ;;  %v498_v47 = vmul.f32 %v3128_v32, %v440_v31  ;;  %v203_v49 = vmul.f32 %v3087_v10, %v145_v41 }
  0x31   :  { %v242_v50 = vmul.f32 %v3090_v12, %v3150_v42  ;;  %vm571_vm2 = vcmp.lt.s32.totalorder %v3113_v24, 32  ;;  %v163_v51 = vmul.f32 %v3085_v9, %v143_v14  ;;  %v415_v53 = vrot.slane %v3124_v30, 1  ;;  %v2795_v24 = vld [vmem:[%s4197_s5 + $0x8] sm:$0xff]  }
  0x32   :  { %v256_v36 = vadd.f32 %v240_v20, %v217_v26  ;;  %v123_v54 = vrot.slane %v3144_v40, 7  ;;  %v219_v56 = vadd.f32 %v203_v49, %v180_v43  ;;  %v3171_v57 = vsel %vm430_vm1, %v414_v44, 0.0 }
  0x33   :  { %v124_v58 = vrot.slane %v3154_v45, 7  ;;  %v537_v59 = vmul.f32 %v3158_v48, %v3136_v37  ;;  %v341_v60 = vmul.f32 %v3100_v16, %v3115_v25  ;;  %v3180_v61 = vsel %vm430_vm1, %v415_v53, 0.0 }
  0x34   :  { %v318_v46 = vadd.f32 %v3118_v27, %v256_v36  ;;  %v3184_v62 = vsel %vm132_vm0, %v123_v54, 0.0  ;;  %v3188_v0 = vmul.f32 %v3085_v9, %v3150_v42  ;;  %v258_v1 = vadd.f32 %v242_v50, %v219_v56 }
  0x35   :  { %v382_v7 = vmul.f32 %v3108_v21, %v3124_v30  ;;  %v3194_v8 = vsel %vm132_vm0, %v124_v58, 0.0  ;;  %v209_v11 = vmul.f32 %v3087_v10, %v3184_v62  ;;  %v420_v14 = vrot.slane %v3144_v40, 1 }
  0x36   :  { %v355_v55 = vadd.f32 %v339_v28, %v318_v46  ;;  %v421_v17 = vrot.slane %v3154_v45, 1  ;;  %v320_v20 = vadd.f32 %v304_v52, %v258_v1  ;;  %v248_v22 = vmul.f32 %v3090_v12, %v3194_v8 }
  0x37   :  { %v179_v26 = vadd.f32 %v3080_v6, %v163_v51  ;;  %v225_v28 = vadd.f32 %v209_v11, %v178_v18  ;;  %v202_v33 = vmul.f32 %v3087_v10, %v3098_v15  ;;  %v461_v43 = vmul.f32 %v3111_v23, %v3136_v37 }
  0x38   :  { %v396_v63 = vadd.f32 %v380_v29, %v355_v55  ;;  %v3206_v29 = vsel %vm430_vm1, %v420_v14, 0.0  ;;  %v3210_v31 = vsel %vm430_vm1, %v421_v17, 0.0  ;;  %v357_v36 = vadd.f32 %v341_v60, %v320_v20 }
  0x39   :  { %v347_v18 = vmul.f32 %v3100_v16, %v3144_v40  ;;  %v264_v44 = vadd.f32 %v248_v22, %v225_v28  ;;  %v218_v46 = vadd.f32 %v202_v33, %v179_v26  ;;  %v241_v49 = vmul.f32 %v3090_v12, %v145_v41 }
  0x3a   :  { %v475_v19 = vadd.f32 %v3139_v38, %v396_v63  ;;  %v303_v50 = vmul.f32 %v3092_v13, %v3073_v4  ;;  %v398_v15 = vadd.f32 %v382_v7, %v357_v36  ;;  %v388_v52 = vmul.f32 %v3108_v21, %v3154_v45 }
  0x3b   :  { %v539_v53 = vmul.f32 %v3158_v48, %v3180_v61  ;;  %v326_v54 = vadd.f32 %v3118_v27, %v264_v44  ;;  %v257_v55 = vadd.f32 %v241_v49, %v218_v46  ;;  %v340_v56 = vmul.f32 %v3100_v16, %v3075_v5  ;;  %v3259_v44 = vld [vmem:[#allocation2 + $0x28] sm:$0xff] }
  0x3c   :  { %v514_v35 = vadd.f32 %v498_v47, %v475_v19  ;;  %v500_v47 = vmul.f32 %v3128_v32, %v3171_v57  ;;  %v477_v58 = vadd.f32 %v461_v43, %v398_v15  ;;  %v165_v60 = vmul.f32 %v3085_v9, %v145_v41 }
  0x3d   :  { %v363_v1 = vadd.f32 %v347_v18, %v326_v54  ;;  %v319_v7 = vadd.f32 %v303_v50, %v257_v55  ;;  %v381_v27 = vmul.f32 %v3108_v21, %v3115_v25  ;;  %v204_v17 = vmul.f32 %v3087_v10, %v3150_v42 }
  0x3e   :  { %v3223_v51 = vadd.f32 %v537_v59, %v514_v35  ;;  %v119_v59 = vrot.slane %v3214_v34, 7  ;;  %v516_v11 = vadd.f32 %v500_v47, %v477_v58  ;;  %v181_v14 = vadd.f32 %v3080_v6, %v165_v60 }
  0x3f   :  { %v404_v19 = vadd.f32 %v388_v52, %v363_v1  ;;  %v506_v41 = vmul.f32 %v3128_v32, %v3206_v29  ;;  %v356_v20 = vadd.f32 %v340_v56, %v319_v7  ;;  %v305_v35 = vmul.f32 %v3092_v13, %v3115_v25 }
  0x40   :  { %v574_v4 = vsel %vm571_vm2, %v3223_v51, 0.0  ;;  %v147_v5 = vsel %vm132_vm0, %v119_v59, 0.0  ;;  %v3250_v28 = vadd.f32 %v539_v53, %v516_v11  ;;  %v220_v33 = vadd.f32 %v204_v17, %v181_v14 }
  0x41   :  { %v591_v63 = vsel %vm590_vm3, %v574_v4, 0.0  ;;  %v243_v22 = vmul.f32 %v3090_v12, %v147_v5  ;;  %v665_v26 = vmul.f32 %v574_v4, %v574_v4  ;;  %v483_v36 = vadd.f32 %v3139_v38, %v404_v19 }
  0x42   :  { %592 = vadd.xlane.f32.xlu0 %v591_v63  ;;  %v545_v43 = vmul.f32 %v3158_v48, %v3210_v31  ;;  %v397_v42 = vadd.f32 %v381_v27, %v356_v20  ;;  %v499_v18 = vmul.f32 %v3128_v32, %v3136_v37  ;;  %v576_v46 = vsel %vm571_vm2, %v3250_v28, 0.0 }
  0x43   :  { %v259_v49 = vadd.f32 %v243_v22, %v220_v33  ;;  %v342_v50 = vmul.f32 %v3100_v16, %v3124_v30  ;;  %v416_v25 = vrot.slane %v3214_v34, 1  ;;  %v597_v38 = vsel %vm590_vm3, %v576_v46, 0.0 }
  0x44   :  { %v522_v15 = vadd.f32 %v506_v41, %v483_v36  ;;  %v476_v47 = vadd.f32 %v3142_v39, %v397_v42  ;;  %v538_v37 = vmul.f32 %v3158_v48, %v3171_v57  ;;  %598 = vadd.xlane.f32.xlu1 %v597_v38  ;;  %v681_v52 = vsel %vm590_vm3, %v665_v26, 0.0  ;;  %v3300_v41 = vld [vmem:[#allocation2 + $0x30] sm:$0xff] }
  0x45   :  { %v321_v53 = vadd.f32 %v305_v35, %v259_v49  ;;  %v383_v54 = vmul.f32 %v3108_v21, %v3214_v34  ;;  %v120_v55 = vrot.slane %v3259_v44, 7  ;;  %v462_v58 = vmul.f32 %v3111_v23, %v3171_v57 }
  0x46   :  { %v3275_v56 = vadd.f32 %v545_v43, %v522_v15  ;;  %v515_v4 = vadd.f32 %v499_v18, %v476_v47  ;;  %v182_v39 = vadd.f32 %v3080_v6, %v3188_v0  ;;  %v444_v60 = vsel %vm430_vm1, %v416_v25, 0.0 }
  0x47   :  { %v358_v59 = vadd.f32 %v342_v50, %v321_v53  ;;  %v148_v63 = vsel %vm132_vm0, %v120_v55, 0.0  ;;  %v205_v1 = vmul.f32 %v3087_v10, %v147_v5  ;;  %v501_v57 = vmul.f32 %v3128_v32, %v3180_v61  ;;  %v3323_v53 = vld [vmem:[#allocation2 + $0x38] sm:$0xff] }
  0x48   :  { %v3289_v7 = vsel %vm571_vm2, %v3275_v56, 0.0  ;;  %v3291_v27 = vadd.f32 %v538_v37, %v515_v4  ;;  %v244_v0 = vmul.f32 %v3090_v12, %v148_v63  ;;  %682 = vadd.xlane.f32.xlu1 %v681_v52  ;;  %v306_v19 = vmul.f32 %v3092_v13, %v3124_v30 }
  0x49   :  { %v615_v11 = vsel %vm590_vm3, %v3289_v7, 0.0  ;;  %v399_v14 = vadd.f32 %v383_v54, %v358_v59  ;;  %v221_v17 = vadd.f32 %v205_v1, %v182_v39  ;;  %v540_v22 = vmul.f32 %v3158_v48, %v444_v60 }
  0x4a   :  { %616 = vadd.xlane.f32.xlu0 %v615_v11  ;;  %v575_v20 = vsel %vm571_vm2, %v3291_v27, 0.0  ;;  %v343_v26 = vmul.f32 %v3100_v16, %v3214_v34  ;;  %v417_v33 = vrot.slane %v3259_v44, 1  ;;  %v667_v30 = vmul.f32 %v576_v46, %v576_v46 }
  0x4b   :  { %v594_v35 = vsel %vm590_vm3, %v575_v20, 0.0  ;;  %v478_v36 = vadd.f32 %v462_v58, %v399_v14  ;;  %v666_v43 = vmul.f32 %v575_v20, %v575_v20  ;;  %v260_v42 = vadd.f32 %v244_v0, %v221_v17 }
  0x4c   :  { %v121_v18 = vrot.slane %v3300_v41, 7  ;;  %v167_v49 = vmul.f32 %v3085_v9, %v147_v5  ;;  %v206_v50 = vmul.f32 %v3087_v10, %v148_v63  ;;  %v463_v25 = vmul.f32 %v3111_v23, %v3180_v61 }
  0x4d   :  { %v517_v38 = vadd.f32 %v501_v57, %v478_v36  ;;  %v322_v15 = vadd.f32 %v306_v19, %v260_v42  ;;  %v384_v47 = vmul.f32 %v3108_v21, %v3259_v44  ;;  %v445_v37 = vsel %vm430_vm1, %v417_v33, 0.0 }
  0x4e   :  { %595 = vadd.xlane.f32.xlu0 %v594_v35  ;;  %v502_v46 = vmul.f32 %v3128_v32, %v444_v60  ;;  %v149_v52 = vsel %vm132_vm0, %v121_v18, 0.0  ;;  %v183_v5 = vadd.f32 %v3080_v6, %v167_v49  ;;  %v684_v61 = vsel %vm590_vm3, %v666_v43, 0.0 }
  0x4f   :  { %v3325_v54 = vadd.f32 %v540_v22, %v517_v38  ;;  %v359_v55 = vadd.f32 %v343_v26, %v322_v15  ;;  %v245_v4 = vmul.f32 %v3090_v12, %v149_v52  ;;  %v687_v58 = vsel %vm590_vm3, %v667_v30, 0.0 }
  0x50   :  { %v222_v39 = vadd.f32 %v206_v50, %v183_v5  ;;  %v307_v59 = vmul.f32 %v3092_v13, %v3214_v34  ;;  %v418_v1 = vrot.slane %v3300_v41, 1  ;;  %v541_v11 = vmul.f32 %v3158_v48, %v445_v37 }
  0x51   :  { %v577_v57 = vsel %vm571_vm2, %v3325_v54, 0.0  ;;  %v400_v0 = vadd.f32 %v384_v47, %v359_v55  ;;  %v122_v14 = vrot.slane %v3323_v53, 7  ;;  %v344_v20 = vmul.f32 %v3100_v16, %v3259_v44 }
  0x52   :  { %v600_v17 = vsel %vm590_vm3, %v577_v57, 0.0  ;;  %685 = vadd.xlane.f32.xlu0 %v684_v61  ;;  %v261_v19 = vadd.f32 %v245_v4, %v222_v39  ;;  %v668_v22 = vmul.f32 %v577_v57, %v577_v57  ;;  %v446_v26 = vsel %vm430_vm1, %v418_v1, 0.0 }
  0x53   :  { %601 = vadd.xlane.f32.xlu1 %v600_v17  ;;  %v479_v34 = vadd.f32 %v463_v25, %v400_v0  ;;  %v168_v33 = vmul.f32 %v3085_v9, %v148_v63  ;;  %v195_v35 = vsel %vm132_vm0, %v122_v14, 0.0  ;;  %v385_v43 = vmul.f32 %v3108_v21, %v3300_v41  ;;  %v3376_v17 = vld [vmem:[#allocation2 + $0x50] sm:$0xff] }
  0x54   :  { %v323_v36 = vadd.f32 %v307_v59, %v261_v19  ;;  %v464_v42 = vmul.f32 %v3111_v23, %v444_v60  ;;  %v207_v30 = vmul.f32 %v3087_v10, %v149_v52  ;;  %v503_v49 = vmul.f32 %v3128_v32, %v445_v37 }
  0x55   :  { %v518_v18 = vadd.f32 %v502_v46, %v479_v34  ;;  %v184_v50 = vadd.f32 %v3080_v6, %v168_v33  ;;  %v246_v25 = vmul.f32 %v3090_v12, %v195_v35  ;;  %v542_v38 = vmul.f32 %v3158_v48, %v446_v26 }
  0x56   :  { %688 = vadd.xlane.f32.xlu0 %v687_v58  ;;  %v360_v63 = vadd.f32 %v344_v20, %v323_v36  ;;  %v690_v15 = vsel %vm590_vm3, %v668_v22, 0.0  ;;  %v419_v47 = vrot.slane %v3323_v53, 1  ;;  %v308_v46 = vmul.f32 %v3092_v13, %v3259_v44 }
  0x57   :  { %v3356_v5 = vadd.f32 %v541_v11, %v518_v18  ;;  %v223_v60 = vadd.f32 %v207_v30, %v184_v50  ;;  %v169_v61 = vmul.f32 %v3085_v9, %v149_v52  ;;  %v345_v4 = vmul.f32 %v3100_v16, %v3300_v41 }
  0x58   :  { %v401_v55 = vadd.f32 %v385_v43, %v360_v63  ;;  %v492_v58 = vsel %vm430_vm1, %v419_v47, 0.0  ;;  %v208_v39 = vmul.f32 %v3087_v10, %v195_v35  ;;  %v3371_v44 = vmul.f32 0.0, %v3090_v12 }
  0x59   :  { %v578_v59 = vsel %vm571_vm2, %v3356_v5, 0.0  ;;  %v262_v1 = vadd.f32 %v246_v25, %v223_v60  ;;  %v185_v57 = vadd.f32 %v3080_v6, %v169_v61  ;;  %v386_v11 = vmul.f32 %v3108_v21, %v3323_v53  ;;  %v3406_v61 = vld [vmem:[#allocation2 + $0x58] sm:$0xff] }
  0x5a   :  { %v603_v52 = vsel %vm590_vm3, %v578_v59, 0.0  ;;  %v480_v0 = vadd.f32 %v464_v42, %v401_v55  ;;  %691 = vadd.xlane.f32.xlu0 %v690_v15  ;;  %v669_v14 = vmul.f32 %v578_v59, %v578_v59  ;;  %v465_v20 = vmul.f32 %v3111_v23, %v445_v37 }
  0x5b   :  { %604 = vadd.xlane.f32.xlu1 %v603_v52  ;;  %v324_v19 = vadd.f32 %v308_v46, %v262_v1  ;;  %v224_v22 = vadd.f32 %v208_v39, %v185_v57  ;;  %v309_v34 = vmul.f32 %v3092_v13, %v3300_v41  ;;  %v504_v35 = vmul.f32 %v3128_v32, %v446_v26 }
  0x5c   :  { %v519_v33 = vadd.f32 %v503_v49, %v480_v0  ;;  %v543_v36 = vmul.f32 %v3158_v48, %v492_v58  ;;  %v693_v43 = vsel %vm590_vm3, %v669_v14, 0.0  ;;  %v346_v18 = vmul.f32 %v3100_v16, %v3323_v53 }
  0x5d   :  { %v361_v42 = vadd.f32 %v345_v4, %v324_v19  ;;  %v263_v30 = vadd.f32 %v3371_v44, %v224_v22  ;;  %v125_v50 = vrot.slane %v3376_v17, 7  ;;  %v3391_v41 = vmul.f32 0.0, %v3108_v21 }
  0x5e   :  { %v3388_v37 = vadd.f32 %v542_v38, %v519_v33  ;;  %694 = vadd.xlane.f32.xlu0 %v693_v43  ;;  %v171_v49 = vmul.f32 %v3085_v9, %v3184_v62  ;;  %v210_v25 = vmul.f32 %v3087_v10, %v3194_v8  ;;  %v466_v47 = vmul.f32 %v3111_v23, %v446_v26 }
  0x5f   :  { %v402_v63 = vadd.f32 %v386_v11, %v361_v42  ;;  %v325_v15 = vadd.f32 %v309_v34, %v263_v30  ;;  %v153_v53 = vsel %vm132_vm0, %v125_v50, 0.0  ;;  %v505_v60 = vmul.f32 %v3128_v32, %v492_v58 }
  0x60   :  { %v579_v38 = vsel %vm571_vm2, %v3388_v37, 0.0  ;;  %v187_v46 = vadd.f32 %v3080_v6, %v171_v49  ;;  %v249_v62 = vmul.f32 %v3090_v12, %v153_v53  ;;  %v3410_v59 = vmul.f32 0.0, %v3158_v48 }
  0x61   :  { %v606_v55 = vsel %vm590_vm3, %v579_v38, 0.0  ;;  %v481_v4 = vadd.f32 %v465_v20, %v402_v63  ;;  %v362_v39 = vadd.f32 %v346_v18, %v325_v15  ;;  %v670_v26 = vmul.f32 %v579_v38, %v579_v38 }
  0x62   :  { %607 = vadd.xlane.f32.xlu1 %v606_v55  ;;  %v226_v1 = vadd.f32 %v210_v25, %v187_v46  ;;  %v311_v57 = vmul.f32 %v3092_v13, %v3144_v40  ;;  %v422_v58 = vrot.slane %v3376_v17, 1  ;;  %v126_v14 = vrot.slane %v3406_v61, 7  ;;  %v3443_v46 = vld [vmem:[#allocation2 + $0x60] sm:$0xff] }
  0x63   :  { %v520_v52 = vadd.f32 %v504_v35, %v481_v4  ;;  %v403_v0 = vadd.f32 %v3391_v41, %v362_v39  ;;  %v696_v11 = vsel %vm590_vm3, %v670_v26, 0.0  ;;  %v348_v20 = vmul.f32 %v3100_v16, %v3154_v45 }
  0x64   :  { %697 = vadd.xlane.f32.xlu0 %v696_v11  ;;  %v265_v19 = vadd.f32 %v249_v62, %v226_v1  ;;  %v172_v22 = vmul.f32 %v3085_v9, %v3194_v8  ;;  %v211_v34 = vmul.f32 %v3087_v10, %v153_v53  ;;  %v389_v35 = vmul.f32 %v3108_v21, %v3376_v17 }
  0x65   :  { %v3423_v40 = vadd.f32 %v543_v36, %v520_v52  ;;  %v482_v33 = vadd.f32 %v466_v47, %v403_v0  ;;  %v154_v43 = vsel %vm132_vm0, %v126_v14, 0.0  ;;  %v3431_v30 = vsel %vm430_vm1, %v422_v58, 0.0 }
  0x66   :  { %v327_v42 = vadd.f32 %v311_v57, %v265_v19  ;;  %v188_v18 = vadd.f32 %v3080_v6, %v172_v22  ;;  %v250_v8 = vmul.f32 %v3090_v12, %v154_v43  ;;  %v468_v49 = vmul.f32 %v3111_v23, %v3206_v29 }
  0x67   :  { %v580_v36 = vsel %vm571_vm2, %v3423_v40, 0.0  ;;  %v521_v50 = vadd.f32 %v505_v60, %v482_v33  ;;  %v312_v25 = vmul.f32 %v3092_v13, %v3154_v45  ;;  %v507_v60 = vmul.f32 %v3128_v32, %v3210_v31 }
  0x68   :  { %v609_v63 = vsel %vm590_vm3, %v580_v36, 0.0  ;;  %v364_v15 = vadd.f32 %v348_v20, %v327_v42  ;;  %v671_v47 = vmul.f32 %v580_v36, %v580_v36  ;;  %v227_v38 = vadd.f32 %v211_v34, %v188_v18 }
  0x69   :  { %610 = vadd.xlane.f32.xlu1 %v609_v63  ;;  %v3446_v62 = vadd.f32 %v3410_v59, %v521_v50  ;;  %v546_v29 = vmul.f32 %v3158_v48, %v3431_v30  ;;  %v423_v55 = vrot.slane %v3406_v61, 1  ;;  %v349_v26 = vmul.f32 %v3100_v16, %v3376_v17 }
  0x6a   :  { %v405_v45 = vadd.f32 %v389_v35, %v364_v15  ;;  %v699_v4 = vsel %vm590_vm3, %v671_v47, 0.0  ;;  %v266_v39 = vadd.f32 %v250_v8, %v227_v38  ;;  %v390_v57 = vmul.f32 %v3108_v21, %v3406_v61  ;;  %v3476_v8 = vld [vmem:[#allocation2 + $0x68] sm:$0xff] }
  0x6b   :  { %v581_v1 = vsel %vm571_vm2, %v3446_v62, 0.0  ;;  %700 = vadd.xlane.f32.xlu0 %v699_v4  ;;  %v127_v58 = vrot.slane %v3443_v46, 7  ;;  %v173_v52 = vmul.f32 %v3085_v9, %v153_v53  ;;  %v3466_v19 = vsel %vm430_vm1, %v423_v55, 0.0 }
  0x6c   :  { %v612_v0 = vsel %vm590_vm3, %v581_v1, 0.0  ;;  %v484_v11 = vadd.f32 %v468_v49, %v405_v45  ;;  %v328_v14 = vadd.f32 %v312_v25, %v266_v39  ;;  %v672_v20 = vmul.f32 %v581_v1, %v581_v1 }
  0x6d   :  { %613 = vadd.xlane.f32.xlu1 %v612_v0  ;;  %v673_v22 = vmul.f32 %v3289_v7, %v3289_v7  ;;  %v155_v34 = vsel %vm132_vm0, %v127_v58, 0.0  ;;  %v189_v33 = vadd.f32 %v3080_v6, %v173_v52  ;;  %v469_v42 = vmul.f32 %v3111_v23, %v3210_v31 }
  0x6e   :  { %v523_v35 = vadd.f32 %v507_v60, %v484_v11  ;;  %v365_v53 = vadd.f32 %v349_v26, %v328_v14  ;;  %v212_v18 = vmul.f32 %v3087_v10, %v154_v43  ;;  %v508_v36 = vmul.f32 %v3128_v32, %v3431_v30  ;;  %v3508_v11 = vld [vmem:[#allocation2 + $0x70] sm:$0xff] }
  0x6f   :  { %v547_v7 = vmul.f32 %v3158_v48, %v3466_v19  ;;  %v251_v50 = vmul.f32 %v3090_v12, %v155_v34  ;;  %v313_v49 = vmul.f32 %v3092_v13, %v3376_v17  ;;  %v424_v31 = vrot.slane %v3443_v46, 1 }
  0x70   :  { %v3485_v25 = vadd.f32 %v546_v29, %v523_v35  ;;  %v406_v63 = vadd.f32 %v390_v57, %v365_v53  ;;  %v228_v15 = vadd.f32 %v212_v18, %v189_v33  ;;  %v702_v47 = vsel %vm590_vm3, %v672_v20, 0.0 }
  0x71   :  { %v705_v38 = vsel %vm590_vm3, %v673_v22, 0.0  ;;  %v128_v60 = vrot.slane %v3476_v8, 7  ;;  %v174_v55 = vmul.f32 %v3085_v9, %v154_v43  ;;  %v350_v29 = vmul.f32 %v3100_v16, %v3406_v61 }
  0x72   :  { %v583_v45 = vsel %vm571_vm2, %v3485_v25, 0.0  ;;  %v485_v4 = vadd.f32 %v469_v42, %v406_v63  ;;  %v267_v17 = vadd.f32 %v251_v50, %v228_v15  ;;  %v391_v26 = vmul.f32 %v3108_v21, %v3443_v46 }
  0x73   :  { %v618_v39 = vsel %vm590_vm3, %v583_v45, 0.0  ;;  %v3502_v1 = vsel %vm430_vm1, %v424_v31, 0.0  ;;  %v156_v43 = vsel %vm132_vm0, %v128_v60, 0.0  ;;  %v190_v52 = vadd.f32 %v3080_v6, %v174_v55 }
  0x74   :  { %619 = vadd.xlane.f32.xlu1 %v618_v39  ;;  %v524_v57 = vadd.f32 %v508_v36, %v485_v4  ;;  %v329_v58 = vadd.f32 %v313_v49, %v267_v17  ;;  %v213_v0 = vmul.f32 %v3087_v10, %v155_v34  ;;  %v674_v14 = vmul.f32 %v583_v45, %v583_v45 }
  0x75   :  { %v470_v20 = vmul.f32 %v3111_v23, %v3431_v30  ;;  %v509_v22 = vmul.f32 %v3128_v32, %v3466_v19  ;;  %v252_v33 = vmul.f32 %v3090_v12, %v156_v43  ;;  %v314_v18 = vmul.f32 %v3092_v13, %v3406_v61 }
  0x76   :  { %v3515_v35 = vadd.f32 %v547_v7, %v524_v57  ;;  %v366_v53 = vadd.f32 %v350_v29, %v329_v58  ;;  %v229_v42 = vadd.f32 %v213_v0, %v190_v52  ;;  %v548_v36 = vmul.f32 %v3158_v48, %v3502_v1  ;;  %v3544_v58 = vld [vmem:[#allocation2 + $0x78] sm:$0xff] }
  0x77   :  { %v351_v50 = vmul.f32 %v3100_v16, %v3443_v46  ;;  %v425_v30 = vrot.slane %v3476_v8, 1  ;;  %v129_v49 = vrot.slane %v3508_v11, 7  ;;  %v175_v31 = vmul.f32 %v3085_v9, %v155_v34 }
  0x78   :  { %703 = vadd.xlane.f32.xlu1 %v702_v47  ;;  %v584_v7 = vsel %vm571_vm2, %v3515_v35, 0.0  ;;  %v407_v63 = vadd.f32 %v391_v26, %v366_v53  ;;  %v268_v15 = vadd.f32 %v252_v33, %v229_v42  ;;  %v392_v17 = vmul.f32 %v3108_v21, %v3476_v8 }
  0x79   :  { %v621_v61 = vsel %vm590_vm3, %v584_v7, 0.0  ;;  %v675_v60 = vmul.f32 %v584_v7, %v584_v7  ;;  %v3532_v55 = vsel %vm430_vm1, %v425_v30, 0.0  ;;  %v157_v45 = vsel %vm132_vm0, %v129_v49, 0.0 }
  0x7a   :  { %622 = vadd.xlane.f32.xlu0 %v621_v61  ;;  %v486_v47 = vadd.f32 %v470_v20, %v407_v63  ;;  %v330_v4 = vadd.f32 %v314_v18, %v268_v15  ;;  %v191_v29 = vadd.f32 %v3080_v6, %v175_v31  ;;  %v708_v34 = vsel %vm590_vm3, %v674_v14, 0.0 }
  0x7b   :  { %v471_v39 = vmul.f32 %v3111_v23, %v3466_v19  ;;  %v214_v26 = vmul.f32 %v3087_v10, %v156_v43  ;;  %v253_v57 = vmul.f32 %v3090_v12, %v157_v45  ;;  %v510_v20 = vmul.f32 %v3128_v32, %v3502_v1 }
  0x7c   :  { %706 = vadd.xlane.f32.xlu1 %v705_v38  ;;  %v525_v52 = vadd.f32 %v509_v22, %v486_v47  ;;  %v367_v0 = vadd.f32 %v351_v50, %v330_v4  ;;  %v549_v33 = vmul.f32 %v3158_v48, %v3532_v55  ;;  %v711_v14 = vsel %vm590_vm3, %v675_v60, 0.0 }
  0x7d   :  { %v230_v53 = vadd.f32 %v214_v26, %v191_v29  ;;  %v315_v19 = vmul.f32 %v3092_v13, %v3443_v46  ;;  %v426_v42 = vrot.slane %v3508_v11, 1  ;;  %v130_v22 = vrot.slane %v3544_v58, 7 }
  0x7e   :  { %709 = vadd.xlane.f32.xlu0 %v708_v34  ;;  %v3554_v18 = vadd.f32 %v548_v36, %v525_v52  ;;  %v408_v38 = vadd.f32 %v392_v17, %v367_v0  ;;  %v176_v50 = vmul.f32 %v3085_v9, %v156_v43  ;;  %v352_v49 = vmul.f32 %v3100_v16, %v3476_v8 }
  0x7f   :  { %v269_v30 = vadd.f32 %v253_v57, %v230_v53  ;;  %v393_v7 = vmul.f32 %v3108_v21, %v3508_v11  ;;  %v215_v63 = vmul.f32 %v3087_v10, %v157_v45  ;;  %v316_v31 = vmul.f32 %v3092_v13, %v3476_v8 }
  0x80   :  { %v585_v46 = vsel %vm571_vm2, %v3554_v18, 0.0  ;;  %v487_v36 = vadd.f32 %v471_v39, %v408_v38  ;;  %v192_v15 = vadd.f32 %v3080_v6, %v176_v50  ;;  %v196_v47 = vsel %vm132_vm0, %v130_v22, 0.0 }
  0x81   :  { %v624_v43 = vsel %vm590_vm3, %v585_v46, 0.0  ;;  %v676_v61 = vmul.f32 %v585_v46, %v585_v46  ;;  %v331_v60 = vadd.f32 %v315_v19, %v269_v30  ;;  %v454_v17 = vsel %vm430_vm1, %v426_v42, 0.0 }
  0x82   :  { %625 = vadd.xlane.f32.xlu1 %v624_v43  ;;  %712 = vadd.xlane.f32.xlu0 %v711_v14  ;;  %v526_v4 = vadd.f32 %v510_v20, %v487_v36  ;;  %v231_v29 = vadd.f32 %v215_v63, %v192_v15  ;;  %v254_v34 = vmul.f32 %v3090_v12, %v196_v47  ;;  %v427_v0 = vrot.slane %v3544_v58, 1 }
  0x83   :  { %v714_v39 = vsel %vm590_vm3, %v676_v61, 0.0  ;;  %v368_v26 = vadd.f32 %v352_v49, %v331_v60  ;;  %v472_v8 = vmul.f32 %v3111_v23, %v3502_v1  ;;  %v353_v2 = vmul.f32 %v3100_v16, %v3508_v11 }
  0x84   :  { %v3578_v57 = vadd.f32 %v549_v33, %v526_v4  ;;  %v270_v52 = vadd.f32 %v254_v34, %v231_v29  ;;  %v511_v14 = vmul.f32 %v3128_v32, %v3532_v55  ;;  %v550_v12 = vmul.f32 %v3158_v48, %v454_v17 }
  0x85   :  { %v409_v20 = vadd.f32 %v393_v7, %v368_v26  ;;  %v177_v53 = vmul.f32 %v3085_v9, %v157_v45  ;;  %v394_v19 = vmul.f32 %v3108_v21, %v3544_v58  ;;  %v216_v42 = vmul.f32 %v3087_v10, %v196_v47 }
  0x86   :  { %v586_v1 = vsel %vm571_vm2, %v3578_v57, 0.0  ;;  %715 = vadd.xlane.f32.xlu0 %v714_v39  ;;  %v332_v33 = vadd.f32 %v316_v31, %v270_v52  ;;  %v473_v9 = vmul.f32 %v3111_v23, %v3532_v55  ;;  %v493_v45 = vsel %vm430_vm1, %v427_v0, 0.0  ;;  %v2793_v0 = vld [vmem:[%s4197_s5 + $0x18] sm:$0xff]  }
  0x87   :  { %v627_v38 = vsel %vm590_vm3, %v586_v1, 0.0  ;;  %v488_v22 = vadd.f32 %v472_v8, %v409_v20  ;;  %v677_v50 = vmul.f32 %v586_v1, %v586_v1  ;;  %v193_v30 = vadd.f32 %v3080_v6, %v177_v53  ;;  %2571 = vmatprep.subr.bf16.mxu0 %v2793_v0  ;;  %v2796_v20 = vld [vmem:[%s4197_s5] sm:$0xff]  }
  0x88   :  { %628 = vadd.xlane.f32.xlu1 %v627_v38  ;;  %v369_v49 = vadd.f32 %v353_v2, %v332_v33  ;;  %v317_v10 = vmul.f32 %v3092_v13, %v3508_v11  ;;  %v512_v36 = vmul.f32 %v3128_v32, %v454_v17  ;;  %v354_v55 = vmul.f32 %v3100_v16, %v3544_v58 }
  0x89   :  { %v527_v7 = vadd.f32 %v511_v14, %v488_v22  ;;  %v717_v63 = vsel %vm590_vm3, %v677_v50, 0.0  ;;  %v232_v21 = vadd.f32 %v216_v42, %v193_v30  ;;  %v551_v31 = vmul.f32 %v3158_v48, %v493_v45  ;;  %2572 = vmatpush3.bf16.msra.mxu0 %v2793_v0 }
  0x8a   :  { %718 = vadd.xlane.f32.xlu0 %v717_v63  ;;  %v410_v46 = vadd.f32 %v394_v19, %v369_v49  ;;  %v474_v4 = vmul.f32 %v3111_v23, %v454_v17  ;;  %v513_v58 = vmul.f32 %v3128_v32, %v493_v45  ;;  %vm1820_vm5 = vcmask 261120  }
  0x8b   :  { %v3603_v6 = vadd.f32 %v550_v12, %v527_v7  ;;  %v271_v15 = vadd.f32 %v3371_v44, %v232_v21 }
  0x8c   :  { %v489_v3 = vadd.f32 %v473_v9, %v410_v46 }
  0x8d   :  { %v587_v43 = vsel %vm571_vm2, %v3603_v6, 0.0  ;;  %v333_v61 = vadd.f32 %v317_v10, %v271_v15 }
  0x8e   :  { %v630_v13 = vsel %vm590_vm3, %v587_v43, 0.0  ;;  %v528_v11 = vadd.f32 %v512_v36, %v489_v3  ;;  %v678_v60 = vmul.f32 %v587_v43, %v587_v43 }
  0x8f   :  { %631 = vadd.xlane.f32.xlu1 %v630_v13  ;;  %v370_v47 = vadd.f32 %v354_v55, %v333_v61 }
  0x90   :  { %v3614_v44 = vadd.f32 %v551_v31, %v528_v11  ;;  %v720_v16 = vsel %vm590_vm3, %v678_v60, 0.0 }
  0x91   :  { %721 = vadd.xlane.f32.xlu0 %v720_v16  ;;  %v411_v48 = vadd.f32 %v3391_v41, %v370_v47 }
  0x92   :  { %v588_v29 = vsel %vm571_vm2, %v3614_v44, 0.0 }
  0x93   :  { %v633_v34 = vsel %vm590_vm3, %v588_v29, 0.0  ;;  %v490_v39 = vadd.f32 %v474_v4, %v411_v48  ;;  %v679_v26 = vmul.f32 %v588_v29, %v588_v29 }
  0x94   :  { %634 = vadd.xlane.f32.xlu1 %v633_v34 }
  0x95   :  { %v529_v8 = vadd.f32 %v513_v58, %v490_v39  ;;  %v723_v23 = vsel %vm590_vm3, %v679_v26, 0.0 }
  0x96   :  { %724 = vadd.xlane.f32.xlu0 %v723_v23 }
  0x97   :  { %v3625_v17 = vadd.f32 %v3410_v59, %v529_v8  ;;  %v2794_v59 = vld [vmem:[%s4197_s5 + $0x10] sm:$0xff]  }
  0x98   :  { %2573 = vmatprep.subr.bf16.mxu0 %v2794_v59 }
  0x99   :  { %v589_v32 = vsel %vm571_vm2, %v3625_v17, 0.0  ;;  %2574 = vmatpush3.bf16.msra.mxu0 %v2794_v59 }
  0x9a   :  { %v636_v41 = vsel %vm590_vm3, %v589_v32, 0.0  ;;  %v680_v52 = vmul.f32 %v589_v32, %v589_v32  ;;  %2575 = vmatprep.subr.bf16.mxu0 %v2795_v24 }
  0x9b   :  { %637 = vadd.xlane.f32.xlu1 %v636_v41 }
  0x9c   :  { %v726_v2 = vsel %vm590_vm3, %v680_v52, 0.0 }
  0x9d   :  { %2576 = vmatpush3.bf16.msra.mxu0 %v2795_v24 }
  0x9e   :  { %2577 = vmatprep.subr.bf16.mxu0 %v2796_v20 }
  0x9f   :  { %727 = vadd.xlane.f32.xlu1 %v726_v2 }
  0xa1   :  { %2578 = vmatpush3.bf16.msra.mxu0 %v2796_v20 }
  0xcb   :  { %v593_v14 = vpop.xlane.xlu0 %592 }
  0xcd   :  { %v599_v53 = vpop.xlane.xlu1 %598 }
  0xd1   :  { %v683_v33 = vpop.xlane.xlu1 %682 }
  0xd3   :  { %v617_v12 = vpop.xlane.xlu0 %616 }
  0xd7   :  { %v596_v1 = vpop.xlane.xlu0 %595 }
  0xd8   :  { %v639_v22 = vadd.f32 %v596_v1, %v593_v14 }
  0xda   :  { %v640_v30 = vadd.f32 %v639_v22, %v599_v53 }
  0xdb   :  { %v686_v19 = vpop.xlane.xlu0 %685 }
  0xdc   :  { %v602_v42 = vpop.xlane.xlu1 %601  ;;  %v729_v46 = vadd.f32 %v686_v19, %v683_v33 }
  0xdd   :  { %v641_v45 = vadd.f32 %v640_v30, %v602_v42 }
  0xdf   :  { %v689_v38 = vpop.xlane.xlu0 %688 }
  0xe0   :  { %v730_v55 = vadd.f32 %v729_v46, %v689_v38 }
  0xe3   :  { %v692_v49 = vpop.xlane.xlu0 %691 }
  0xe4   :  { %v605_v50 = vpop.xlane.xlu1 %604  ;;  %v731_v43 = vadd.f32 %v730_v55, %v692_v49 }
  0xe5   :  { %v642_v63 = vadd.f32 %v641_v45, %v605_v50 }
  0xe7   :  { %v695_v7 = vpop.xlane.xlu0 %694 }
  0xe8   :  { %v732_v13 = vadd.f32 %v731_v43, %v695_v7 }
  0xeb   :  { %v608_v9 = vpop.xlane.xlu1 %607 }
  0xec   :  { %v643_v10 = vadd.f32 %v642_v63, %v608_v9 }
  0xed   :  { %v698_v15 = vpop.xlane.xlu0 %697 }
  0xee   :  { %v733_v47 = vadd.f32 %v732_v13, %v698_v15 }
  0xf2   :  { %v611_v21 = vpop.xlane.xlu1 %610 }
  0xf3   :  { %v644_v36 = vadd.f32 %v643_v10, %v611_v21 }
  0xf4   :  { %v701_v60 = vpop.xlane.xlu0 %700 }
  0xf5   :  { %v734_v48 = vadd.f32 %v733_v47, %v701_v60 }
  0xf6   :  { %v614_v3 = vpop.xlane.xlu1 %613 }
  0xf7   :  { %v645_v31 = vadd.f32 %v644_v36, %v614_v3 }
  0xf9   :  { %v646_v61 = vrot.slane %v645_v31, 4 }
  0xfb   :  { %v647_v11 = vadd.f32 %v646_v61, %v645_v31 }
  0xfd   :  { %v648_v4 = vrot.slane %v647_v11, 2  ;;  %v620_v16 = vpop.xlane.xlu1 %619 }
  0xfe   :  { %v652_v49 = vadd.f32 %v620_v16, %v617_v12 }
  0xff   :  { %v649_v58 = vadd.f32 %v648_v4, %v647_v11 }
 0x101   :  { %v704_v29 = vpop.xlane.xlu1 %703  ;;  %v650_v26 = vrot.slane %v649_v58, 1 }
 0x102   :  { %v735_v34 = vadd.f32 %v734_v48, %v704_v29  ;;  %v3653_v48 = vld [vmem:[%s4195_s3] ss:$0 sm:$0xff] }
 0x103   :  { %v623_v39 = vpop.xlane.xlu0 %622  ;;  %v651_v52 = vadd.f32 %v650_v26, %v649_v58 }
 0x104   :  { %v736_v8 = vrot.slane %v735_v34, 4  ;;  %v653_v7 = vadd.f32 %v652_v49, %v623_v39 }
 0x105   :  { %v707_v32 = vpop.xlane.xlu1 %706  ;;  %v756_v24 = vmul.f32 0.00048828125, %v651_v52 }
 0x106   :  { %v737_v23 = vadd.f32 %v736_v8, %v735_v34 }
 0x107   :  { %v710_v41 = vpop.xlane.xlu0 %709  ;;  %v760_v19 = vmul.f32 %v756_v24, %v756_v24  ;;  %v764_v43 = vsub.f32 %v3223_v51, %v756_v24  ;;  %v765_v61 = vsub.f32 %v3291_v27, %v756_v24  ;;  %v766_v13 = vsub.f32 %v3250_v28, %v756_v24 }
 0x108   :  { %v738_v2 = vrot.slane %v737_v23, 2  ;;  %v742_v9 = vadd.f32 %v710_v41, %v707_v32  ;;  %v767_v12 = vsub.f32 %v3325_v54, %v756_v24  ;;  %v768_v11 = vsub.f32 %v3356_v5, %v756_v24  ;;  %v3660_v41 = vld [vmem:[%s4196_s4] ss:$0 sm:$0xff] }
 0x109   :  { %v769_v60 = vsub.f32 %v3388_v37, %v756_v24  ;;  %v770_v58 = vsub.f32 %v3423_v40, %v756_v24  ;;  %v771_v29 = vsub.f32 %v3446_v62, %v756_v24 }
 0x10a   :  { %v739_v0 = vadd.f32 %v738_v2, %v737_v23 }
 0x10b   :  { %v713_v59 = vpop.xlane.xlu0 %712  ;;  %v626_v14 = vpop.xlane.xlu1 %625 }
 0x10c   :  { %v740_v20 = vrot.slane %v739_v0, 1  ;;  %v743_v63 = vadd.f32 %v742_v9, %v713_v59  ;;  %v654_v21 = vadd.f32 %v653_v7, %v626_v14 }
 0x10e   :  { %v741_v53 = vadd.f32 %v740_v20, %v739_v0 }
 0x10f   :  { %v716_v1 = vpop.xlane.xlu0 %715 }
 0x110   :  { %v758_v33 = vmul.f32 0.00048828125, %v741_v53  ;;  %v744_v10 = vadd.f32 %v743_v63, %v716_v1 }
 0x111   :  { %v629_v38 = vpop.xlane.xlu1 %628 }
 0x112   :  { %v762_v42 = vsub.f32 %v758_v33, %v760_v19  ;;  %v655_v36 = vadd.f32 %v654_v21, %v629_v38 }
 0x113   :  { %v719_v50 = vpop.xlane.xlu0 %718 }
 0x114   :  { %v780_v22 = vadd.f32 1e-05, %v762_v42  ;;  %v745_v15 = vadd.f32 %v744_v10, %v719_v50 }
 0x116   :  { %2815 = vrsqrt.f32 %v780_v22 }
 0x118   :  { %v632_v30 = vpop.xlane.xlu1 %631 }
 0x119   :  { %v656_v3 = vadd.f32 %v655_v36, %v632_v30 }
 0x11a   :  { %v722_v45 = vpop.xlane.xlu0 %721 }
 0x11b   :  { %v746_v31 = vadd.f32 %v745_v15, %v722_v45 }
 0x11d   :  { %v635_v46 = vpop.xlane.xlu1 %634 }
 0x11e   :  { %v657_v4 = vadd.f32 %v656_v3, %v635_v46 }
 0x11f   :  { %v725_v55 = vpop.xlane.xlu0 %724 }
 0x120   :  { %v747_v16 = vadd.f32 %v746_v31, %v725_v55 }
 0x123   :  { %v2816_v47 = vpop.eup %2815 }
 0x124   :  { %v638_v34 = vpop.xlane.xlu1 %637  ;;  %v784_v39 = vmul.f32 %v2816_v47, %v764_v43  ;;  %v785_v26 = vmul.f32 %v2816_v47, %v765_v61  ;;  %v786_v8 = vmul.f32 %v2816_v47, %v766_v13  ;;  %v787_v23 = vmul.f32 %v2816_v47, %v767_v12 }
 0x125   :  { %v658_v32 = vadd.f32 %v657_v4, %v638_v34  ;;  %v788_v52 = vmul.f32 %v2816_v47, %v768_v11  ;;  %v789_v2 = vmul.f32 %v2816_v47, %v769_v60  ;;  %v790_v0 = vmul.f32 %v2816_v47, %v770_v58 }
 0x126   :  { %v807_v59 = vmul.f32 %v3653_v48, %v784_v39  ;;  %v808_v20 = vmul.f32 %v3653_v48, %v785_v26  ;;  %v809_v24 = vmul.f32 %v3653_v48, %v786_v8  ;;  %v810_v14 = vmul.f32 %v3653_v48, %v787_v23 }
 0x127   :  { %v659_v53 = vrot.slane %v658_v32, 4  ;;  %v811_v1 = vmul.f32 %v3653_v48, %v788_v52  ;;  %v812_v33 = vmul.f32 %v3653_v48, %v789_v2  ;;  %v791_v19 = vmul.f32 %v2816_v47, %v771_v29 }
 0x128   :  { %v728_v42 = vpop.xlane.xlu1 %727  ;;  %v830_v38 = vadd.f32 %v3660_v41, %v807_v59  ;;  %v831_v22 = vadd.f32 %v3660_v41, %v808_v20  ;;  %v832_v50 = vadd.f32 %v3660_v41, %v809_v24  ;;  %v833_v30 = vadd.f32 %v3660_v41, %v810_v14 }
 0x129   :  { %v660_v49 = vadd.f32 %v659_v53, %v658_v32  ;;  %v748_v9 = vadd.f32 %v747_v16, %v728_v42  ;;  %v834_v45 = vadd.f32 %v3660_v41, %v811_v1  ;;  %v835_v7 = vadd.f32 %v3660_v41, %v812_v33 }
 0x12a   :  { %v846_v63 = vpack.c.bf16 %v831_v22, %v830_v38  ;;  %v847_v21 = vpack.c.bf16 %v833_v30, %v832_v50  ;;  %v813_v36 = vmul.f32 %v3653_v48, %v790_v0  ;;  %v814_v15 = vmul.f32 %v3653_v48, %v791_v19 }
 0x12b   :  { %v661_v10 = vrot.slane %v660_v49, 2  ;;  %v749_v46 = vrot.slane %v748_v9, 4  ;;  %v848_v55 = vpack.c.bf16 %v835_v7, %v834_v45 }
 0x12c   :  { %2579 = vmatprep.mubr.msk.bf16.mxu0 %vm590_vm3, %v846_v63  ;;  %v836_v13 = vadd.f32 %v3660_v41, %v813_v36  ;;  %v837_v12 = vadd.f32 %v3660_v41, %v814_v15 }
 0x12d   :  { %v662_v3 = vadd.f32 %v661_v10, %v660_v49  ;;  %v750_v31 = vadd.f32 %v749_v46, %v748_v9  ;;  %2580 = vmatmul.mubr.msk.bf16.vlgmr.msra.gmra.mxu0 %vm590_vm3, %v847_v21 }
 0x12e   :  { %2583 = vmatprep.mubr.msk.bf16.mxu0 %vm590_vm3, %v848_v55  ;;  %v849_v16 = vpack.c.bf16 %v837_v12, %v836_v13 }
 0x12f   :  { %v663_v43 = vrot.slane %v662_v3, 1  ;;  %v751_v61 = vrot.slane %v750_v31, 2 }
 0x131   :  { %v664_v11 = vadd.f32 %v663_v43, %v662_v3  ;;  %v752_v60 = vadd.f32 %v751_v61, %v750_v31 }
 0x133   :  { %v757_v47 = vmul.f32 0.00048828125, %v664_v11  ;;  %v753_v4 = vrot.slane %v752_v60, 1 }
 0x135   :  { %v754_v58 = vadd.f32 %v753_v4, %v752_v60  ;;  %2584 = vmatmul.mubr.msk.bf16.gmra.mxu0 %vm590_vm3, %v849_v16  ;;  %v761_v34 = vmul.f32 %v757_v47, %v757_v47  ;;  %v772_v8 = vsub.f32 %v3275_v56, %v757_v47  ;;  %v773_v23 = vsub.f32 %v3485_v25, %v757_v47 }
 0x136   :  { %v774_v32 = vsub.f32 %v3515_v35, %v757_v47  ;;  %v775_v52 = vsub.f32 %v3554_v18, %v757_v47  ;;  %v776_v0 = vsub.f32 %v3578_v57, %v757_v47  ;;  %v777_v59 = vsub.f32 %v3603_v6, %v757_v47 }
 0x137   :  { %v759_v29 = vmul.f32 0.00048828125, %v754_v58  ;;  %v778_v19 = vsub.f32 %v3614_v44, %v757_v47  ;;  %v779_v42 = vsub.f32 %v3625_v17, %v757_v47 }
 0x139   :  { %v763_v39 = vsub.f32 %v759_v29, %v761_v34 }
 0x13b   :  { %v781_v26 = vadd.f32 1e-05, %v763_v39 }
 0x13d   :  { %2817 = vrsqrt.f32 %v781_v26 }
 0x14a   :  { %v2818_v2 = vpop.eup %2817 }
 0x14b   :  { %v792_v20 = vmul.f32 %v2818_v2, %v772_v8  ;;  %v793_v24 = vmul.f32 %v2818_v2, %v773_v23  ;;  %v794_v14 = vmul.f32 %v2818_v2, %v774_v32  ;;  %v795_v53 = vmul.f32 %v2818_v2, %v775_v52 }
 0x14c   :  { %v796_v1 = vmul.f32 %v2818_v2, %v776_v0  ;;  %v797_v33 = vmul.f32 %v2818_v2, %v777_v59  ;;  %v798_v45 = vmul.f32 %v2818_v2, %v778_v19  ;;  %v799_v7 = vmul.f32 %v2818_v2, %v779_v42 }
 0x14d   :  { %v815_v38 = vmul.f32 %v3653_v48, %v792_v20  ;;  %v816_v22 = vmul.f32 %v3653_v48, %v793_v24  ;;  %v817_v50 = vmul.f32 %v3653_v48, %v794_v14  ;;  %v818_v30 = vmul.f32 %v3653_v48, %v795_v53 }
 0x14e   :  { %v819_v49 = vmul.f32 %v3653_v48, %v796_v1  ;;  %v820_v9 = vmul.f32 %v3653_v48, %v797_v33  ;;  %v821_v31 = vmul.f32 %v3653_v48, %v798_v45  ;;  %v822_v43 = vmul.f32 %v3653_v48, %v799_v7  ;;  %v2403_v48 = vld [vmem:[%s4198_s6] ss:$0 sm:$0xff]  ;;  %s2976_s6 = smov 112  }
 0x14f   :  { %v838_v63 = vadd.f32 %v3660_v41, %v815_v38  ;;  %v839_v21 = vadd.f32 %v3660_v41, %v816_v22  ;;  %v840_v10 = vadd.f32 %v3660_v41, %v817_v50  ;;  %v841_v46 = vadd.f32 %v3660_v41, %v818_v30 }
 0x150   :  { %v842_v36 = vadd.f32 %v3660_v41, %v819_v49  ;;  %v843_v15 = vadd.f32 %v3660_v41, %v820_v9  ;;  %v844_v13 = vadd.f32 %v3660_v41, %v821_v31  ;;  %v845_v12 = vadd.f32 %v3660_v41, %v822_v43 }
 0x151   :  { %v850_v55 = vpack.c.bf16 %v839_v21, %v838_v63  ;;  %v851_v3 = vpack.c.bf16 %v841_v46, %v840_v10 }
 0x152   :  { %v852_v61 = vpack.c.bf16 %v843_v15, %v842_v36  ;;  %v853_v11 = vpack.c.bf16 %v845_v12, %v844_v13 }
 0x153   :  { %2587 = vmatprep.mubr.msk.bf16.mxu0 %vm590_vm3, %v850_v55 }
 0x154   :  { %2588 = vmatmul.mubr.msk.bf16.gmra.mxu0 %vm590_vm3, %v851_v3 }
 0x155   :  { %2591 = vmatprep.mubr.msk.bf16.mxu0 %vm590_vm3, %v852_v61 }
 0x15c   :  { %2592 = vmatmul.mubr.msk.bf16.gmra.mxu0 %vm590_vm3, %v853_v11 }
 0x1ed   :  { %v2581_v60 = vpop.f32.mrf.mxu0 }
 0x1ee   :  { %v960_v24 = vadd.f32 %v2581_v60, %v2403_v48 }
 0x1ef   :  { %v951_v47 = vpop.f32.mrf.mxu0 }
 0x1f0   :  { %v952_v58 = vadd.f32 %v2403_v48, %v951_v47 }
 0x1f1   :  { %v2582_v4 = vpop.f32.mrf.mxu0 }
 0x1f2   :  { %v963_v59 = vadd.f32 %v2582_v4, %v2403_v48 }
 0x1f3   :  { %v954_v16 = vpop.f32.mrf.mxu0 }
 0x1f4   :  { %v955_v29 = vadd.f32 %v2403_v48, %v954_v16  ;;  %v1015_v14 = vpack.c.bf16 %v963_v59, %v960_v24 }
 0x1f5   :  { %v2585_v34 = vpop.f32.mrf.mxu0 }
 0x1f6   :  { %v3713_v39 = vpack.c.bf16 %v955_v29, %v952_v58  ;;  %v976_v8 = vadd.f32 %v2585_v34, %v2403_v48 }
 0x1f7   :  { %v967_v26 = vpop.f32.mrf.mxu0 }
 0x1f8   :  { %2603 = vmatprep.mubr.msk.bf16.mxu1 %vm1034_vm4, %v3713_v39  ;;  %v968_v52 = vadd.f32 %v2403_v48, %v967_v26 }
 0x1f9   :  { %v2586_v41 = vpop.f32.mrf.mxu0 }
 0x1fa   :  { %v979_v23 = vadd.f32 %v2586_v41, %v2403_v48 }
 0x1fb   :  { %v970_v32 = vpop.f32.mrf.mxu0 }
 0x1fc   :  { %v3717_v2 = vpack.c.bf16 %v979_v23, %v976_v8  ;;  %v971_v0 = vadd.f32 %v2403_v48, %v970_v32 }
 0x1fe   :  { %v1016_v20 = vpack.c.bf16 %v971_v0, %v968_v52  ;;  %1032 = vrot.lane.b32.xlu0 %v3717_v2, %s2976_s6 }
 0x200   :  { %1030 = vrot.lane.b32.xlu1 %v1016_v20, %s2976_s6 }
 0x202   :  { %1026 = vrot.lane.b32.xlu0 %v3713_v39, %s2976_s6 }
 0x204   :  { %1028 = vrot.lane.b32.xlu1 %v1015_v14, %s2976_s6 }
 0x214   :  { %v2589_v53 = vpop.f32.mrf.mxu0 }
 0x215   :  { %v992_v19 = vadd.f32 %v2589_v53, %v2403_v48 }
 0x216   :  { %v983_v1 = vpop.f32.mrf.mxu0 }
 0x217   :  { %v984_v22 = vadd.f32 %v2403_v48, %v983_v1 }
 0x218   :  { %v2590_v33 = vpop.f32.mrf.mxu0 }
 0x219   :  { %v995_v42 = vadd.f32 %v2590_v33, %v2403_v48 }
 0x21a   :  { %v986_v38 = vpop.f32.mrf.mxu0 }
 0x21b   :  { %v3725_v50 = vpack.c.bf16 %v995_v42, %v992_v19  ;;  %v987_v30 = vadd.f32 %v2403_v48, %v986_v38 }
 0x21c   :  { %v2593_v49 = vpop.f32.mrf.mxu0 }
 0x21d   :  { %v3727_v9 = vpack.c.bf16 %v987_v30, %v984_v22  ;;  %1130 = vrot.lane.b32.xlu0 %v3725_v50, %s2976_s6  ;;  %v1008_v63 = vadd.f32 %v2593_v49, %v2403_v48 }
 0x21e   :  { %v999_v45 = vpop.f32.mrf.mxu0 }
 0x21f   :  { %2619 = vmatprep.mubr.msk.bf16.mxu0 %vm1034_vm4, %v3727_v9  ;;  %v1000_v15 = vadd.f32 %v2403_v48, %v999_v45 }
 0x220   :  { %v2594_v7 = vpop.f32.mrf.mxu0 }
 0x221   :  { %v1011_v21 = vadd.f32 %v2594_v7, %v2403_v48  ;;  %1431 = vrot.lane.b32.xlu0 %v3717_v2, %s2977_s27 }
 0x222   :  { %v1002_v10 = vpop.f32.mrf.mxu0 }
 0x223   :  { %v3735_v46 = vpack.c.bf16 %v1011_v21, %v1008_v63  ;;  %v1003_v36 = vadd.f32 %v2403_v48, %v1002_v10 }
 0x225   :  { %1427 = vrot.lane.b32.xlu0 %v1015_v14, %s2977_s27  ;;  %1134 = vrot.lane.b32.xlu1 %v3735_v46, %s2976_s6  ;;  %v3740_v55 = vpack.c.bf16 %v1003_v36, %v1000_v15 }
 0x229   :  { %1132 = vrot.lane.b32.xlu1 %v3740_v55, %s2976_s6 }
 0x22d   :  { %1128 = vrot.lane.b32.xlu1 %v3727_v9, %s2976_s6 }
 0x231   :  { %1429 = vrot.lane.b32.xlu1 %v1016_v20, %s2977_s27 }
 0x270   :  { %v1033_v3 = vpop.permute.xlu0 %1032 }
 0x271   :  { %2775 = vmatprep.subr.msk.bf16.mxu1 %vm1034_vm4, %v1033_v3  ;;  %v1057_v31 = vsel %vm1034_vm4, %v1033_v3, 0 }
 0x272   :  { %v1031_v43 = vpop.permute.xlu1 %1030  ;;  %2596 = vmatpush3.bf16.xpose.msra.mxu1 %v1057_v31 }
 0x273   :  { %2776 = vmatprep.subr.msk.bf16.mxu1 %vm1034_vm4, %v1031_v43  ;;  %v1054_v61 = vsel %vm1034_vm4, %v1031_v43, 0 }
 0x274   :  { %v1027_v11 = vpop.permute.xlu0 %1026 }
 0x275   :  { %v1048_v60 = vsel %vm1034_vm4, %v1027_v11, 0 }
 0x276   :  { %v1029_v13 = vpop.permute.xlu1 %1028 }
 0x277   :  { %v1051_v12 = vsel %vm1034_vm4, %v1029_v13, 0 }
 0x27a   :  { %2598 = vmatpush3.bf16.xpose.msra.mxu1 %v1054_v61 }
 0x27b   :  { %2777 = vmatprep.subr.msk.bf16.mxu1 %vm1034_vm4, %v1029_v13 }
 0x282   :  { %2600 = vmatpush3.bf16.xpose.msra.mxu1 %v1051_v12 }
 0x283   :  { %2778 = vmatprep.subr.msk.bf16.mxu1 %vm1034_vm4, %v1027_v11 }
 0x28a   :  { %2602 = vmatpush3.bf16.xpose.msra.mxu1 %v1048_v60 }
 0x28f   :  { %v1131_v47 = vpop.permute.xlu0 %1130 }
 0x290   :  { %v1152_v8 = vsel %vm1034_vm4, %v1131_v47, 0 }
 0x291   :  { %2604 = vmatmul.mubr.msk.bf16.vlgmr.msra.gmra.mxu1 %vm1034_vm4, %v1015_v14 }
 0x292   :  { %2607 = vmatprep.mubr.msk.bf16.mxu1 %vm1034_vm4, %v1016_v20 }
 0x293   :  { %v1432_v4 = vpop.permute.xlu0 %1431 }
 0x294   :  { %2627 = vmatprep.subr.bf16.mxu1 %v1432_v4 }
 0x295   :  { %2628 = vmatpush3.bf16.msra.mxu1 %v1432_v4 }
 0x297   :  { %v1135_v48 = vpop.permute.xlu1 %1134  ;;  %v1428_v41 = vpop.permute.xlu0 %1427 }
 0x298   :  { %v1158_v16 = vsel %vm1034_vm4, %v1135_v48, 0  ;;  %2779 = vmatprep.subr.msk.bf16.mxu0 %vm1034_vm4, %v1135_v48 }
 0x299   :  { %2612 = vmatpush3.bf16.xpose.msra.mxu0 %v1158_v16  ;;  %2608 = vmatmul.mubr.msk.bf16.gmra.mxu1 %vm1034_vm4, %v3717_v2 }
 0x29b   :  { %v1133_v58 = vpop.permute.xlu1 %1132 }
 0x29c   :  { %2780 = vmatprep.subr.msk.bf16.mxu0 %vm1034_vm4, %v1133_v58  ;;  %v1155_v34 = vsel %vm1034_vm4, %v1133_v58, 0 }
 0x29f   :  { %v1129_v29 = vpop.permute.xlu1 %1128 }
 0x2a0   :  { %v1149_v23 = vsel %vm1034_vm4, %v1129_v29, 0 }
 0x2a1   :  { %2614 = vmatpush3.bf16.xpose.msra.mxu0 %v1155_v34 }
 0x2a2   :  { %2781 = vmatprep.subr.msk.bf16.mxu0 %vm1034_vm4, %v1131_v47 }
 0x2a3   :  { %v1430_v26 = vpop.permute.xlu1 %1429 }
 0x2a4   :  { %2629 = vmatprep.subr.bf16.mxu1 %v1430_v26 }
 0x2a5   :  { %2630 = vmatpush3.bf16.msra.mxu1 %v1430_v26 }
 0x2a6   :  { %2631 = vmatprep.subr.bf16.mxu1 %v1428_v41 }
 0x2a9   :  { %2616 = vmatpush3.bf16.xpose.msra.mxu0 %v1152_v8  ;;  %2632 = vmatpush3.bf16.msra.mxu1 %v1428_v41 }
 0x2aa   :  { %2782 = vmatprep.subr.msk.bf16.mxu0 %vm1034_vm4, %v1129_v29 }
 0x2b1   :  { %2618 = vmatpush3.bf16.xpose.msra.mxu0 %v1149_v23 }
 0x2b8   :  { %2620 = vmatmul.mubr.msk.bf16.vlgmr.msra.gmra.mxu0 %vm1034_vm4, %v3725_v50 }
 0x2b9   :  { %2623 = vmatprep.mubr.msk.bf16.mxu0 %vm1034_vm4, %v3740_v55 }
 0x2c0   :  { %2624 = vmatmul.mubr.msk.bf16.gmra.mxu0 %vm1034_vm4, %v3735_v46 }
 0x351   :  { %v2605_v32 = vpop.f32.mrf.mxu1 }
 0x352   :  { %v3773_v52 = vmul.f32 0.25, %v2605_v32 }
 0x353   :  { %v1093_v2 = vpop.f32.mrf.mxu1 }
 0x354   :  { %v3775_v0 = vmul.f32 0.25, %v1093_v2  ;;  %v1247_v59 = vsel %vm590_vm3, %v3773_v52, -inf }
 0x355   :  { %1248 = vmax.xlane.f32.xlu0 %v1247_v59  ;;  %v2606_v20 = vpop.f32.mrf.mxu1 }
 0x356   :  { %v3779_v14 = vmul.f32 0.25, %v2606_v20  ;;  %v1241_v1 = vsel %vm590_vm3, %v3775_v0, -inf }
 0x357   :  { %v1096_v24 = vpop.f32.mrf.mxu1 }
 0x358   :  { %v3781_v53 = vmul.f32 0.25, %v1096_v24  ;;  %v1250_v22 = vsel %vm590_vm3, %v3779_v14, -inf }
 0x359   :  { %1242 = vmax.xlane.f32.xlu0 %v1241_v1  ;;  %v2609_v33 = vpop.f32.mrf.mxu1 }
 0x35a   :  { %v1244_v19 = vsel %vm590_vm3, %v3781_v53, -inf  ;;  %v3787_v38 = vmul.f32 0.25, %v2609_v33 }
 0x35b   :  { %1245 = vmax.xlane.f32.xlu1 %v1244_v19  ;;  %v1109_v42 = vpop.f32.mrf.mxu1 }
 0x35c   :  { %v3793_v7 = vmul.f32 0.25, %v1109_v42  ;;  %v1259_v21 = vsel %vm590_vm3, %v3787_v38, -inf }
 0x35d   :  { %1251 = vmax.xlane.f32.xlu0 %v1250_v22  ;;  %v2610_v30 = vpop.f32.mrf.mxu1 }
 0x35e   :  { %v3791_v49 = vmul.f32 0.25, %v2610_v30  ;;  %v1253_v36 = vsel %vm590_vm3, %v3793_v7, -inf }
 0x35f   :  { %v1112_v45 = vpop.f32.mrf.mxu1 }
 0x360   :  { %v3795_v63 = vmul.f32 0.25, %v1112_v45  ;;  %v1262_v10 = vsel %vm590_vm3, %v3791_v49, -inf }
 0x361   :  { %1260 = vmax.xlane.f32.xlu0 %v1259_v21  ;;  %1263 = vmax.xlane.f32.xlu1 %v1262_v10 }
 0x362   :  { %v1256_v15 = vsel %vm590_vm3, %v3795_v63, -inf }
 0x365   :  { %1254 = vmax.xlane.f32.xlu0 %v1253_v36  ;;  %1257 = vmax.xlane.f32.xlu1 %v1256_v15 }
 0x378   :  { %v2621_v3 = vpop.f32.mrf.mxu0 }
 0x379   :  { %v3805_v31 = vmul.f32 0.25, %v2621_v3 }
 0x37a   :  { %v1194_v43 = vpop.f32.mrf.mxu0 }
 0x37b   :  { %v3807_v61 = vmul.f32 0.25, %v1194_v43  ;;  %v1271_v13 = vsel %vm590_vm3, %v3805_v31, -inf }
 0x37c   :  { %1272 = vmax.xlane.f32.xlu0 %v1271_v13  ;;  %v2622_v12 = vpop.f32.mrf.mxu0 }
 0x37d   :  { %v3811_v11 = vmul.f32 0.25, %v2622_v12  ;;  %v1265_v4 = vsel %vm590_vm3, %v3807_v61, -inf }
 0x37e   :  { %v1197_v60 = vpop.f32.mrf.mxu0 }
 0x37f   :  { %v3813_v47 = vmul.f32 0.25, %v1197_v60  ;;  %v1274_v48 = vsel %vm590_vm3, %v3811_v11, -inf }
 0x380   :  { %1266 = vmax.xlane.f32.xlu0 %v1265_v4  ;;  %1275 = vmax.xlane.f32.xlu1 %v1274_v48  ;;  %v2625_v16 = vpop.f32.mrf.mxu0 }
 0x381   :  { %v3819_v58 = vmul.f32 0.25, %v2625_v16  ;;  %v1268_v26 = vsel %vm590_vm3, %v3813_v47, -inf }
 0x382   :  { %v1210_v29 = vpop.f32.mrf.mxu0 }
 0x383   :  { %v3821_v34 = vmul.f32 0.25, %v1210_v29  ;;  %v1283_v41 = vsel %vm590_vm3, %v3819_v58, -inf }
 0x384   :  { %1269 = vmax.xlane.f32.xlu1 %v1268_v26  ;;  %1284 = vmax.xlane.f32.xlu0 %v1283_v41  ;;  %v2626_v23 = vpop.f32.mrf.mxu0 }
 0x385   :  { %v1277_v8 = vsel %vm590_vm3, %v3821_v34, -inf  ;;  %v3833_v32 = vmul.f32 0.25, %v2626_v23 }
 0x386   :  { %v1213_v2 = vpop.f32.mrf.mxu0 }
 0x387   :  { %v3835_v59 = vmul.f32 0.25, %v1213_v2  ;;  %v1286_v20 = vsel %vm590_vm3, %v3833_v32, -inf }
 0x388   :  { %1278 = vmax.xlane.f32.xlu0 %v1277_v8 }
 0x389   :  { %v1280_v24 = vsel %vm590_vm3, %v3835_v59, -inf }
 0x395   :  { %1520 = vrot.lane.b32.xlu1 %v3735_v46, %s2977_s27 }
 0x39e   :  { %1425 = vrot.lane.b32.xlu0 %v3713_v39, %s2977_s27 }
 0x3b9   :  { %1287 = vmax.xlane.f32.xlu1 %v1286_v20 }
 0x3bd   :  { %1281 = vmax.xlane.f32.xlu1 %v1280_v24 }
 0x3ce   :  { %1518 = vrot.lane.b32.xlu1 %v3740_v55, %s2977_s27 }
 0x3de   :  { %v1249_v46 = vpop.xlane.xlu0 %1248 }
 0x3df   :  { %v1291_v39 = vsub.f32 %v3773_v52, %v1249_v46 }
 0x3e1   :  { %v1309_v1 = vmul.f32 1.442695, %v1291_v39 }
 0x3e2   :  { %v1243_v33 = vpop.xlane.xlu0 %1242 }
 0x3e3   :  { %2819 = vpow2.f32 %v1309_v1  ;;  %v1289_v19 = vsub.f32 %v3775_v0, %v1243_v33 }
 0x3e4   :  { %v1246_v42 = vpop.xlane.xlu1 %1245 }
 0x3e5   :  { %v1305_v22 = vmul.f32 1.442695, %v1289_v19  ;;  %v1290_v30 = vsub.f32 %v3781_v53, %v1246_v42 }
 0x3e6   :  { %v1252_v45 = vpop.xlane.xlu0 %1251 }
 0x3e7   :  { %2821 = vpow2.f32 %v1305_v22  ;;  %v1292_v21 = vsub.f32 %v3779_v14, %v1252_v45  ;;  %v1307_v10 = vmul.f32 1.442695, %v1290_v30 }
 0x3e9   :  { %v1311_v36 = vmul.f32 1.442695, %v1292_v21 }
 0x3ea   :  { %v1264_v15 = vpop.xlane.xlu1 %1263  ;;  %v1261_v55 = vpop.xlane.xlu0 %1260 }
 0x3eb   :  { %2823 = vpow2.f32 %v1311_v36  ;;  %v1296_v52 = vsub.f32 %v3791_v49, %v1264_v15  ;;  %v1295_v3 = vsub.f32 %v3787_v38, %v1261_v55 }
 0x3ec   :  { %2825 = vpow2.f32 %v1307_v10 }
 0x3ed   :  { %v1319_v43 = vmul.f32 1.442695, %v1296_v52  ;;  %v1317_v0 = vmul.f32 1.442695, %v1295_v3 }
 0x3ee   :  { %v1258_v13 = vpop.xlane.xlu1 %1257  ;;  %v1255_v12 = vpop.xlane.xlu0 %1254 }
 0x3ef   :  { %v1294_v53 = vsub.f32 %v3795_v63, %v1258_v13  ;;  %v1293_v60 = vsub.f32 %v3793_v7, %v1255_v12  ;;  %2827 = vpow2.f32 %v1317_v0 }
 0x3f0   :  { %v3851_v4 = vpop.eup %2819  ;;  %2829 = vpow2.f32 %v1319_v43 }
 0x3f1   :  { %v1315_v14 = vmul.f32 1.442695, %v1294_v53  ;;  %v1313_v48 = vmul.f32 1.442695, %v1293_v60  ;;  %v1343_v49 = vsel %vm590_vm3, %v3851_v4, 0.0 }
 0x3f2   :  { %1344 = vadd.xlane.f32.xlu0 %v1343_v49 }
 0x3f3   :  { %2831 = vpow2.f32 %v1313_v48 }
 0x3f4   :  { %v3855_v38 = vpop.eup %2821  ;;  %2833 = vpow2.f32 %v1315_v14 }
 0x3f5   :  { %v1337_v16 = vsel %vm590_vm3, %v3855_v38, 0.0 }
 0x3f6   :  { %1338 = vadd.xlane.f32.xlu0 %v1337_v16 }
 0x3f8   :  { %v3859_v63 = vpop.eup %2823 }
 0x3f9   :  { %v1346_v7 = vsel %vm590_vm3, %v3859_v63, 0.0  ;;  %v3863_v29 = vpop.eup %2825 }
 0x3fa   :  { %1347 = vadd.xlane.f32.xlu1 %v1346_v7  ;;  %v1340_v41 = vsel %vm590_vm3, %v3863_v29, 0.0 }
 0x3fc   :  { %v3865_v26 = vpop.eup %2827 }
 0x3fd   :  { %v3869_v8 = vpop.eup %2829  ;;  %v1355_v23 = vsel %vm590_vm3, %v3865_v26, 0.0 }
 0x3fe   :  { %1341 = vadd.xlane.f32.xlu1 %v1340_v41  ;;  %1356 = vadd.xlane.f32.xlu0 %v1355_v23  ;;  %v1358_v20 = vsel %vm590_vm3, %v3869_v8, 0.0 }
 0x400   :  { %v3873_v2 = vpop.eup %2831 }
 0x401   :  { %v3877_v24 = vpop.eup %2833  ;;  %v1349_v46 = vsel %vm590_vm3, %v3873_v2, 0.0 }
 0x402   :  { %1359 = vadd.xlane.f32.xlu1 %v1358_v20  ;;  %1350 = vadd.xlane.f32.xlu0 %v1349_v46  ;;  %v1352_v1 = vsel %vm590_vm3, %v3877_v24, 0.0 }
 0x405   :  { %v1273_v39 = vpop.xlane.xlu0 %1272 }
 0x406   :  { %v1299_v33 = vsub.f32 %v3805_v31, %v1273_v39  ;;  %1353 = vadd.xlane.f32.xlu1 %v1352_v1 }
 0x408   :  { %v1325_v19 = vmul.f32 1.442695, %v1299_v33 }
 0x409   :  { %v1276_v42 = vpop.xlane.xlu1 %1275  ;;  %v1267_v22 = vpop.xlane.xlu0 %1266 }
 0x40a   :  { %2835 = vpow2.f32 %v1325_v19  ;;  %v1300_v30 = vsub.f32 %v3811_v11, %v1276_v42  ;;  %v1297_v45 = vsub.f32 %v3807_v61, %v1267_v22 }
 0x40c   :  { %v1321_v21 = vmul.f32 1.442695, %v1297_v45  ;;  %v1327_v10 = vmul.f32 1.442695, %v1300_v30 }
 0x40d   :  { %v1270_v36 = vpop.xlane.xlu1 %1269  ;;  %v1285_v15 = vpop.xlane.xlu0 %1284 }
 0x40e   :  { %v1298_v55 = vsub.f32 %v3813_v47, %v1270_v36  ;;  %v1303_v52 = vsub.f32 %v3819_v58, %v1285_v15  ;;  %2837 = vpow2.f32 %v1321_v21 }
 0x40f   :  { %2839 = vpow2.f32 %v1327_v10 }
 0x410   :  { %v1333_v3 = vmul.f32 1.442695, %v1303_v52  ;;  %v1323_v31 = vmul.f32 1.442695, %v1298_v55 }
 0x411   :  { %v1521_v43 = vpop.permute.xlu1 %1520  ;;  %v1279_v0 = vpop.xlane.xlu0 %1278 }
 0x412   :  { %v1301_v13 = vsub.f32 %v3821_v34, %v1279_v0  ;;  %2643 = vmatprep.subr.bf16.mxu0 %v1521_v43  ;;  %2841 = vpow2.f32 %v1333_v3 }
 0x413   :  { %2644 = vmatpush3.bf16.msra.mxu0 %v1521_v43  ;;  %2843 = vpow2.f32 %v1323_v31 }
 0x414   :  { %v1329_v61 = vmul.f32 1.442695, %v1301_v13 }
 0x415   :  { %v1426_v11 = vpop.permute.xlu0 %1425 }
 0x416   :  { %2845 = vpow2.f32 %v1329_v61  ;;  %2633 = vmatprep.subr.bf16.mxu1 %v1426_v11 }
 0x417   :  { %v3889_v12 = vpop.eup %2835  ;;  %2634 = vmatpush3.bf16.msra.mxu1 %v1426_v11 }
 0x418   :  { %v1367_v47 = vsel %vm590_vm3, %v3889_v12, 0.0 }
 0x419   :  { %1368 = vadd.xlane.f32.xlu1 %v1367_v47 }
 0x41b   :  { %v3893_v58 = vpop.eup %2837 }
 0x41c   :  { %v1361_v34 = vsel %vm590_vm3, %v3893_v58, 0.0  ;;  %v3897_v53 = vpop.eup %2839 }
 0x41d   :  { %1362 = vadd.xlane.f32.xlu1 %v1361_v34  ;;  %v1370_v14 = vsel %vm590_vm3, %v3897_v53, 0.0 }
 0x41f   :  { %v3899_v60 = vpop.eup %2841 }
 0x420   :  { %v1379_v48 = vsel %vm590_vm3, %v3899_v60, 0.0  ;;  %v3905_v49 = vpop.eup %2843 }
 0x421   :  { %1371 = vadd.xlane.f32.xlu1 %v1370_v14  ;;  %1380 = vadd.xlane.f32.xlu0 %v1379_v48  ;;  %v1364_v41 = vsel %vm590_vm3, %v3905_v49, 0.0 }
 0x423   :  { %v3907_v16 = vpop.eup %2845 }
 0x424   :  { %v1373_v7 = vsel %vm590_vm3, %v3907_v16, 0.0 }
 0x425   :  { %1365 = vadd.xlane.f32.xlu1 %v1364_v41  ;;  %1374 = vadd.xlane.f32.xlu0 %v1373_v7 }
 0x442   :  { %v1288_v23 = vpop.xlane.xlu1 %1287 }
 0x443   :  { %v1304_v20 = vsub.f32 %v3833_v32, %v1288_v23 }
 0x445   :  { %v1335_v46 = vmul.f32 1.442695, %v1304_v20 }
 0x446   :  { %v1282_v39 = vpop.xlane.xlu1 %1281 }
 0x447   :  { %2847 = vpow2.f32 %v1335_v46  ;;  %v1302_v1 = vsub.f32 %v3835_v59, %v1282_v39  ;;  %v2797_v59 = vld [vmem:[%s4200_s8 + $0x18] sm:$0xff]  }
 0x448   :  { %2659 = vmatprep.subr.bf16.mxu1 %v2797_v59 }
 0x449   :  { %v1331_v33 = vmul.f32 1.442695, %v1302_v1 }
 0x44a   :  { %v1519_v19 = vpop.permute.xlu1 %1518 }
 0x44b   :  { %2849 = vpow2.f32 %v1331_v33  ;;  %2645 = vmatprep.subr.bf16.mxu0 %v1519_v19 }
 0x44c   :  { %2646 = vmatpush3.bf16.msra.mxu0 %v1519_v19 }
 0x454   :  { %v3915_v42 = vpop.eup %2847 }
 0x455   :  { %v1382_v22 = vsel %vm590_vm3, %v3915_v42, 0.0 }
 0x456   :  { %1383 = vadd.xlane.f32.xlu0 %v1382_v22 }
 0x458   :  { %v3919_v30 = vpop.eup %2849 }
 0x459   :  { %v1376_v32 = vsel %vm590_vm3, %v3919_v30, 0.0 }
 0x45a   :  { %1377 = vadd.xlane.f32.xlu1 %v1376_v32 }
 0x46b   :  { %1514 = vrot.lane.b32.xlu1 %v3727_v9, %s2977_s27 }
 0x46c   :  { %1516 = vrot.lane.b32.xlu0 %v3725_v50, %s2977_s27 }
 0x47b   :  { %v1345_v45 = vpop.xlane.xlu0 %1344 }
 0x47f   :  { %v1339_v21 = vpop.xlane.xlu0 %1338 }
 0x483   :  { %v1348_v10 = vpop.xlane.xlu1 %1347 }
 0x484   :  { %2851 = vrcp.f32 %v1348_v10 }
 0x485   :  { %2853 = vrcp.f32 %v1339_v21 }
 0x486   :  { %2855 = vrcp.f32 %v1345_v45 }
 0x487   :  { %v1342_v36 = vpop.xlane.xlu1 %1341  ;;  %v1357_v15 = vpop.xlane.xlu0 %1356 }
 0x488   :  { %2857 = vrcp.f32 %v1342_v36  ;;  %v2801_v36 = vld [vmem:[%s4200_s8] sm:$0xff]  }
 0x48b   :  { %v1360_v55 = vpop.xlane.xlu1 %1359  ;;  %v1351_v52 = vpop.xlane.xlu0 %1350 }
 0x48c   :  { %2859 = vrcp.f32 %v1360_v55  ;;  %v1633_v55 = vmax.f32 %v3250_v28, 0.0 }
 0x48d   :  { %2861 = vrcp.f32 %v1351_v52  ;;  %v1634_v52 = vmax.f32 %v3325_v54, 0.0 }
 0x48e   :  { %2863 = vrcp.f32 %v1357_v15 }
 0x48f   :  { %v1354_v50 = vpop.xlane.xlu1 %1353 }
 0x490   :  { %2865 = vrcp.f32 %v1354_v50 }
 0x491   :  { %v2852_v9 = vpop.eup %2851 }
 0x492   :  { %v2854_v3 = vpop.eup %2853  ;;  %v1404_v0 = vmul.f32 %v2852_v9, %v3859_v63  ;;  %v2800_v9 = vld [vmem:[#allocation7 + $0x8] sm:$0xff]  }
 0x493   :  { %v2856_v31 = vpop.eup %2855  ;;  %v1401_v13 = vmul.f32 %v2854_v3, %v3855_v38  ;;  %v1631_v3 = vmax.f32 %v3223_v51, 0.0 }
 0x494   :  { %v1403_v11 = vmul.f32 %v2856_v31, %v3851_v4  ;;  %v1632_v31 = vmax.f32 %v3291_v27, 0.0 }
 0x495   :  { %v2858_v43 = vpop.eup %2857 }
 0x496   :  { %v1402_v61 = vmul.f32 %v2858_v43, %v3863_v29  ;;  %v1418_v34 = vpack.c.bf16 %v1404_v0, %v1403_v11  ;;  %v2802_v11 = vld [vmem:[#allocation7] sm:$0xff]  }
 0x498   :  { %v1417_v47 = vpack.c.bf16 %v1402_v61, %v1401_v13  ;;  %v1647_v13 = vpack.c.bf16 %v1632_v31, %v1631_v3 }
 0x499   :  { %v2860_v14 = vpop.eup %2859 }
 0x49a   :  { %2635 = vmatprep.mubr.msk.bf16.mxu1 %vm590_vm3, %v1417_v47  ;;  %v2862_v48 = vpop.eup %2861  ;;  %v1408_v23 = vmul.f32 %v2860_v14, %v3869_v8  ;;  %v1648_v47 = vpack.c.bf16 %v1634_v52, %v1633_v55 }
 0x49b   :  { %2636 = vmatmul.mubr.msk.bf16.vlgmr.msra.gmra.mxu1 %vm590_vm3, %v1418_v34  ;;  %v2864_v7 = vpop.eup %2863  ;;  %v1405_v63 = vmul.f32 %v2862_v48, %v3873_v2  ;;  %v1636_v34 = vmax.f32 %v3388_v37, 0.0  ;;  %v1637_v48 = vmax.f32 %v3423_v40, 0.0 }
 0x49c   :  { %2660 = vmatpush3.bf16.msra.mxu1 %v2797_v59  ;;  %v1407_v29 = vmul.f32 %v2864_v7, %v3865_v26  ;;  %v2798_v59 = vld [vmem:[%s4200_s8 + $0x10] sm:$0xff]   ;;  %v1638_v7 = vmax.f32 %v3446_v62, 0.0 }
 0x49d   :  { %v2866_v41 = vpop.eup %2865  ;;  %2661 = vmatprep.subr.bf16.mxu1 %v2798_v59 }
 0x49e   :  { %v1406_v38 = vmul.f32 %v2866_v41, %v3877_v24  ;;  %v1420_v20 = vpack.c.bf16 %v1408_v23, %v1407_v29 }
 0x4a0   :  { %v1419_v4 = vpack.c.bf16 %v1406_v38, %v1405_v63  ;;  %2662 = vmatpush3.bf16.msra.mxu1 %v2798_v59  ;;  %v1650_v63 = vpack.c.bf16 %v1638_v7, %v1637_v48 }
 0x4a2   :  { %v1369_v46 = vpop.xlane.xlu1 %1368  ;;  %2639 = vmatprep.mubr.msk.bf16.mxu1 %vm590_vm3, %v1419_v4 }
 0x4a3   :  { %2640 = vmatmul.mubr.msk.bf16.gmra.mxu1 %vm590_vm3, %v1420_v20 }
 0x4a4   :  { %2667 = vmatprep.mubr.msk.bf16.mxu1 %vm590_vm3, %v1647_v13 }
 0x4a6   :  { %v1363_v39 = vpop.xlane.xlu1 %1362 }
 0x4a7   :  { %2867 = vrcp.f32 %v1363_v39 }
 0x4aa   :  { %v1372_v1 = vpop.xlane.xlu1 %1371  ;;  %v1381_v26 = vpop.xlane.xlu0 %1380 }
 0x4ae   :  { %v1366_v33 = vpop.xlane.xlu1 %1365  ;;  %v1375_v32 = vpop.xlane.xlu0 %1374 }
 0x4af   :  { %2869 = vrcp.f32 %v1366_v33  ;;  %v1639_v33 = vmax.f32 %v3275_v56, 0.0 }
 0x4b0   :  { %2871 = vrcp.f32 %v1372_v1 }
 0x4b1   :  { %2873 = vrcp.f32 %v1369_v46 }
 0x4b4   :  { %v2868_v19 = vpop.eup %2867 }
 0x4b5   :  { %v1409_v2 = vmul.f32 %v2868_v19, %v3893_v58  ;;  %v2799_v58 = vld [vmem:[%s4200_s8 + $0x8] sm:$0xff]   ;;  %v1640_v19 = vmax.f32 %v3485_v25, 0.0 }
 0x4b6   :  { %2663 = vmatprep.subr.bf16.mxu1 %v2799_v58 }
 0x4b7   :  { %2664 = vmatpush3.bf16.msra.mxu1 %v2799_v58 }
 0x4b8   :  { %2665 = vmatprep.subr.bf16.mxu1 %v2801_v36 }
 0x4bb   :  { %2666 = vmatpush3.bf16.msra.mxu1 %v2801_v36 }
 0x4bc   :  { %v2870_v8 = vpop.eup %2869 }
 0x4bd   :  { %v1410_v24 = vmul.f32 %v2870_v8, %v3905_v49  ;;  %v2872_v49 = vpop.eup %2871  ;;  %v1651_v8 = vpack.c.bf16 %v1640_v19, %v1639_v33 }
 0x4be   :  { %v2874_v15 = vpop.eup %2873  ;;  %v1412_v50 = vmul.f32 %v2872_v49, %v3897_v53  ;;  %2668 = vmatmul.mubr.msk.bf16.vlgmr.msra.gmra.mxu1 %vm590_vm3, %v1648_v47  ;;  %v1635_v53 = vmax.f32 %v3356_v5, 0.0 }
 0x4bf   :  { %v1421_v22 = vpack.c.bf16 %v1410_v24, %v1409_v2  ;;  %v1411_v0 = vmul.f32 %v2874_v15, %v3889_v12  ;;  %v1644_v2 = vmax.f32 %v3603_v6, 0.0  ;;  %v1645_v24 = vmax.f32 %v3614_v44, 0.0 }
 0x4c0   :  { %v1649_v14 = vpack.c.bf16 %v1636_v34, %v1635_v53  ;;  %v2803_v34 = vld [vmem:[%s4202_s10 + $0x18] sm:$0xff]  }
 0x4c1   :  { %2651 = vmatprep.mubr.msk.bf16.mxu0 %vm590_vm3, %v1421_v22  ;;  %v1422_v61 = vpack.c.bf16 %v1412_v50, %v1411_v0  ;;  %v1646_v22 = vmax.f32 %v3625_v17, 0.0  ;;  %2703 = vmatprep.subr.bf16.mxu1 %v2803_v34 }
 0x4c2   :  { %2671 = vmatprep.mubr.msk.bf16.mxu1 %vm590_vm3, %v1649_v14  ;;  %2704 = vmatpush3.bf16.msra.mxu1 %v2803_v34 }
 0x4c6   :  { %2672 = vmatmul.mubr.msk.bf16.gmra.mxu1 %vm590_vm3, %v1650_v63 }
 0x4c7   :  { %2675 = vmatprep.mubr.msk.bf16.mxu1 %vm590_vm3, %v1651_v8 }
 0x4df   :  { %v1384_v45 = vpop.xlane.xlu0 %1383 }
 0x4e0   :  { %2875 = vrcp.f32 %v1384_v45 }
 0x4e1   :  { %2877 = vrcp.f32 %v1375_v32  ;;  %v1654_v32 = vpack.c.bf16 %v1646_v22, %v1645_v24  ;;  %v2807_v24 = vld [vmem:[%s4204_s12 + $0x38] sm:$0xff]   ;;  %v4013_v22 = vld [vmem:[%s4204_s12 + $0x30] sm:$0xff]  }
 0x4e2   :  { %2879 = vrcp.f32 %v1381_v26 }
 0x4e3   :  { %v1378_v21 = vpop.xlane.xlu1 %1377  ;;  %v1517_v10 = vpop.permute.xlu0 %1516 }
 0x4e4   :  { %2881 = vrcp.f32 %v1378_v21  ;;  %2647 = vmatprep.subr.bf16.mxu0 %v1517_v10 }
 0x4e5   :  { %2648 = vmatpush3.bf16.msra.mxu0 %v1517_v10 }
 0x4e7   :  { %v1515_v43 = vpop.permute.xlu1 %1514 }
 0x4e8   :  { %2649 = vmatprep.subr.bf16.mxu0 %v1515_v43 }
 0x4e9   :  { %2650 = vmatpush3.bf16.msra.mxu0 %v1515_v43 }
 0x4ea   :  { %2683 = vmatprep.subr.bf16.mxu0 %v2800_v9 }
 0x4ec   :  { %2652 = vmatmul.mubr.msk.bf16.vlgmr.msra.gmra.mxu0 %vm590_vm3, %v1422_v61 }
 0x4ed   :  { %2684 = vmatpush3.bf16.msra.mxu0 %v2800_v9  ;;  %v2876_v12 = vpop.eup %2875 }
 0x4ee   :  { %2685 = vmatprep.subr.bf16.mxu0 %v2802_v11  ;;  %v2878_v41 = vpop.eup %2877  ;;  %v1416_v29 = vmul.f32 %v2876_v12, %v3915_v42  ;;  %v1641_v42 = vmax.f32 %v3515_v35, 0.0 }
 0x4ef   :  { %v2880_v23 = vpop.eup %2879  ;;  %v1413_v4 = vmul.f32 %v2878_v41, %v3907_v16  ;;  %v1642_v16 = vmax.f32 %v3554_v18, 0.0  ;;  %v2804_v41 = vld [vmem:[%s4202_s10 + $0x10] sm:$0xff]  }
 0x4f0   :  { %v1415_v46 = vmul.f32 %v2880_v23, %v3899_v60  ;;  %v1643_v60 = vmax.f32 %v3578_v57, 0.0  ;;  %2705 = vmatprep.subr.bf16.mxu1 %v2804_v41 }
 0x4f1   :  { %v2882_v38 = vpop.eup %2881  ;;  %2686 = vmatpush3.bf16.msra.mxu0 %v2802_v11  ;;  %2706 = vmatpush3.bf16.msra.mxu1 %v2804_v41 }
 0x4f2   :  { %v1414_v20 = vmul.f32 %v2882_v38, %v3919_v30  ;;  %v1424_v1 = vpack.c.bf16 %v1416_v29, %v1415_v46  ;;  %v1652_v30 = vpack.c.bf16 %v1642_v16, %v1641_v42  ;;  %v1653_v26 = vpack.c.bf16 %v1644_v2, %v1643_v60  ;;  %v2805_v29 = vld [vmem:[%s4202_s10 + $0x8] sm:$0xff]   ;;  %2727 = vmatprep.subr.bf16.mxu0 %v2807_v24 }
 0x4f3   :  { %2707 = vmatprep.subr.bf16.mxu1 %v2805_v29 }
 0x4f4   :  { %v1423_v39 = vpack.c.bf16 %v1414_v20, %v1413_v4  ;;  %2676 = vmatmul.mubr.msk.bf16.gmra.mxu1 %vm590_vm3, %v1652_v30 }
 0x4f5   :  { %2679 = vmatprep.mubr.msk.bf16.mxu1 %vm590_vm3, %v1653_v26  ;;  %2708 = vmatpush3.bf16.msra.mxu1 %v2805_v29 }
 0x4f6   :  { %2655 = vmatprep.mubr.msk.bf16.mxu0 %vm590_vm3, %v1423_v39 }
 0x4f7   :  { %2656 = vmatmul.mubr.msk.bf16.gmra.mxu0 %vm590_vm3, %v1424_v1  ;;  %v2806_v1 = vld [vmem:[%s4202_s10] sm:$0xff]  }
 0x4f8   :  { %2709 = vmatprep.subr.bf16.mxu1 %v2806_v1 }
 0x4f9   :  { %2710 = vmatpush3.bf16.msra.mxu1 %v2806_v1 }
 0x4fa   :  { %2759 = vmatprep.subr.bf16.mxu1 %v2807_v24 }
 0x4fc   :  { %2680 = vmatmul.mubr.msk.bf16.gmra.mxu1 %vm590_vm3, %v1654_v32  ;;  %v2809_v32 = vld [vmem:[%s4204_s12 + $0x28] sm:$0xff]  }
 0x55b   :  { %v2637_v59 = vpop.f32.mrf.mxu1 }
 0x55c   :  { %v1605_v15 = vmax.f32 %v2637_v59, 0.0 }
 0x55d   :  { %v1483_v45 = vpop.f32.mrf.mxu1 }
 0x55e   :  { %v1603_v10 = vmax.f32 %v1483_v45, 0.0  ;;  %v2810_v45 = vld [vmem:[%s4204_s12 + $0x20] sm:$0xff]  }
 0x55f   :  { %v2638_v58 = vpop.f32.mrf.mxu1 }
 0x560   :  { %v1606_v49 = vmax.f32 %v2638_v58, 0.0 }
 0x561   :  { %v1486_v21 = vpop.f32.mrf.mxu1 }
 0x562   :  { %v1604_v36 = vmax.f32 %v1486_v21, 0.0  ;;  %v1620_v50 = vpack.c.bf16 %v1606_v49, %v1605_v15  ;;  %v2811_v49 = vld [vmem:[%s4204_s12 + $0x18] sm:$0xff]  }
 0x563   :  { %v2641_v55 = vpop.f32.mrf.mxu1 }
 0x564   :  { %v1619_v52 = vpack.c.bf16 %v1604_v36, %v1603_v10  ;;  %v1609_v61 = vmax.f32 %v2641_v55, 0.0 }
 0x565   :  { %v1499_v9 = vpop.f32.mrf.mxu1 }
 0x566   :  { %2687 = vmatprep.mubr.msk.bf16.mxu0 %vm1820_vm5, %v1619_v52  ;;  %v1607_v0 = vmax.f32 %v1499_v9, 0.0 }
 0x567   :  { %v2642_v3 = vpop.f32.mrf.mxu1  ;;  %2688 = vmatmul.mubr.msk.bf16.vlgmr.msra.gmra.mxu0 %vm1820_vm5, %v1620_v50 }
 0x568   :  { %v1610_v31 = vmax.f32 %v2642_v3, 0.0  ;;  %2728 = vmatpush3.bf16.msra.mxu0 %v2807_v24  ;;  %v4029_v3 = vld [vmem:[%s4201_s9] ss:$0 sm:$0xff] }
 0x569   :  { %v1502_v43 = vpop.f32.mrf.mxu1  ;;  %2729 = vmatprep.subr.bf16.mxu0 %v4013_v22 }
 0x56a   :  { %v1608_v13 = vmax.f32 %v1502_v43, 0.0  ;;  %v1622_v47 = vpack.c.bf16 %v1610_v31, %v1609_v61 }
 0x56c   :  { %v1621_v11 = vpack.c.bf16 %v1608_v13, %v1607_v0  ;;  %2730 = vmatpush3.bf16.msra.mxu0 %v4013_v22 }
 0x56d   :  { %2731 = vmatprep.subr.bf16.mxu0 %v2809_v32 }
 0x56e   :  { %2691 = vmatprep.mubr.msk.bf16.mxu0 %vm1820_vm5, %v1621_v11 }
 0x56f   :  { %2692 = vmatmul.mubr.msk.bf16.gmra.mxu0 %vm1820_vm5, %v1622_v47 }
 0x570   :  { %2732 = vmatpush3.bf16.msra.mxu0 %v2809_v32 }
 0x571   :  { %2733 = vmatprep.subr.bf16.mxu0 %v2810_v45 }
 0x574   :  { %2734 = vmatpush3.bf16.msra.mxu0 %v2810_v45 }
 0x575   :  { %2735 = vmatprep.subr.bf16.mxu0 %v2811_v49 }
 0x578   :  { %2736 = vmatpush3.bf16.msra.mxu0 %v2811_v49 }
 0x57e   :  { %v2669_v26 = vpop.f32.mrf.mxu1 }
 0x580   :  { %v1745_v59 = vpop.f32.mrf.mxu1 }
 0x582   :  { %v2670_v58 = vpop.f32.mrf.mxu1 }
 0x584   :  { %v1748_v21 = vpop.f32.mrf.mxu1 }
 0x586   :  { %v2673_v36 = vpop.f32.mrf.mxu1 }
 0x588   :  { %v1761_v9 = vpop.f32.mrf.mxu1 }
 0x5ac   :  { %v2653_v53 = vpop.f32.mrf.mxu0 }
 0x5ad   :  { %v1613_v38 = vmax.f32 %v2653_v53, 0.0  ;;  %v2674_v53 = vpop.f32.mrf.mxu1 }
 0x5ae   :  { %v1572_v12 = vpop.f32.mrf.mxu0 }
 0x5af   :  { %v1611_v23 = vmax.f32 %v1572_v12, 0.0  ;;  %v1764_v29 = vpop.f32.mrf.mxu1 }
 0x5b0   :  { %v2654_v14 = vpop.f32.mrf.mxu0 }
 0x5b1   :  { %v1614_v48 = vmax.f32 %v2654_v14, 0.0 }
 0x5b2   :  { %v1575_v7 = vpop.f32.mrf.mxu0 }
 0x5b3   :  { %v1612_v63 = vmax.f32 %v1575_v7, 0.0  ;;  %v1624_v20 = vpack.c.bf16 %v1614_v48, %v1613_v38 }
 0x5b5   :  { %v1623_v4 = vpack.c.bf16 %v1612_v63, %v1611_v23 }
 0x5b7   :  { %v2657_v46 = vpop.f32.mrf.mxu0  ;;  %2695 = vmatprep.mubr.msk.bf16.mxu0 %vm1820_vm5, %v1623_v4 }
 0x5b8   :  { %2696 = vmatmul.mubr.msk.bf16.gmra.mxu0 %vm1820_vm5, %v1624_v20  ;;  %v1617_v30 = vmax.f32 %v2657_v46, 0.0 }
 0x5b9   :  { %v1588_v39 = vpop.f32.mrf.mxu0 }
 0x5ba   :  { %v1615_v16 = vmax.f32 %v1588_v39, 0.0 }
 0x5bb   :  { %v2658_v33 = vpop.f32.mrf.mxu0 }
 0x5bc   :  { %v1618_v19 = vmax.f32 %v2658_v33, 0.0 }
 0x5bd   :  { %v1591_v42 = vpop.f32.mrf.mxu0 }
 0x5be   :  { %v1616_v8 = vmax.f32 %v1591_v42, 0.0  ;;  %v1626_v2 = vpack.c.bf16 %v1618_v19, %v1617_v30 }
 0x5c0   :  { %v1625_v60 = vpack.c.bf16 %v1616_v8, %v1615_v16 }
 0x5c2   :  { %2699 = vmatprep.mubr.msk.bf16.mxu0 %vm1820_vm5, %v1625_v60 }
 0x5c3   :  { %2700 = vmatmul.mubr.msk.bf16.gmra.mxu0 %vm1820_vm5, %v1626_v2 }
 0x627   :  { %v2689_v10 = vpop.f32.mrf.mxu0 }
 0x628   :  { %v1888_v52 = vadd.f32 %v2689_v10, %v2669_v26 }
 0x629   :  { %v1879_v15 = vpop.f32.mrf.mxu0 }
 0x62a   :  { %v1880_v55 = vadd.f32 %v1879_v15, %v1745_v59  ;;  %v1951_v11 = vadd.f32 %v4029_v3, %v1888_v52  ;;  %v2812_v59 = vld [vmem:[%s4204_s12 + $0x10] sm:$0xff]  }
 0x62b   :  { %v2690_v50 = vpop.f32.mrf.mxu0  ;;  %2737 = vmatprep.subr.bf16.mxu0 %v2812_v59 }
 0x62c   :  { %v1891_v31 = vadd.f32 %v2690_v50, %v2670_v58  ;;  %v1949_v0 = vadd.f32 %v4029_v3, %v1880_v55  ;;  %v4045_v23 = vadd.f32 %v1951_v11, %v3250_v28  ;;  %2738 = vmatpush3.bf16.msra.mxu0 %v2812_v59  ;;  %v2813_v50 = vld [vmem:[%s4204_s12 + $0x8] sm:$0xff]  }
 0x62d   :  { %v1882_v43 = vpop.f32.mrf.mxu0  ;;  %2739 = vmatprep.subr.bf16.mxu0 %v2813_v50 }
 0x62e   :  { %v1952_v13 = vadd.f32 %v4029_v3, %v1891_v31  ;;  %v1883_v61 = vadd.f32 %v1882_v43, %v1748_v21  ;;  %v4039_v48 = vadd.f32 %v1949_v0, %v3223_v51 }
 0x62f   :  { %v2693_v47 = vpop.f32.mrf.mxu0 }
 0x630   :  { %v1950_v34 = vadd.f32 %v4029_v3, %v1883_v61  ;;  %v4036_v12 = vadd.f32 %v1952_v13, %v3325_v54  ;;  %v1904_v63 = vadd.f32 %v2693_v47, %v2673_v36  ;;  %2740 = vmatpush3.bf16.msra.mxu0 %v2813_v50 }
 0x631   :  { %v1895_v14 = vpop.f32.mrf.mxu0 }
 0x632   :  { %v4042_v7 = vadd.f32 %v1950_v34, %v3291_v27  ;;  %v1896_v41 = vadd.f32 %v1895_v14, %v1761_v9  ;;  %v1982_v54 = vpack.c.bf16 %v4036_v12, %v4045_v23  ;;  %v1955_v28 = vadd.f32 %v4029_v3, %v1904_v63 }
 0x633   :  { %v2694_v38 = vpop.f32.mrf.mxu0 }
 0x634   :  { %v1981_v4 = vpack.c.bf16 %v4042_v7, %v4039_v48  ;;  %v1907_v20 = vadd.f32 %v2694_v38, %v2674_v53  ;;  %v1953_v51 = vadd.f32 %v4029_v3, %v1896_v41  ;;  %v4068_v16 = vadd.f32 %v1955_v28, %v3423_v40 }
 0x635   :  { %v1898_v46 = vpop.f32.mrf.mxu0 }
 0x636   :  { %v1956_v27 = vadd.f32 %v4029_v3, %v1907_v20  ;;  %v1899_v39 = vadd.f32 %v1898_v46, %v1764_v29  ;;  %2711 = vmatprep.mubr.msk.bf16.mxu1 %vm590_vm3, %v1981_v4  ;;  %v4062_v19 = vadd.f32 %v1953_v51, %v3356_v5  ;;  %v2677_v5 = vpop.f32.mrf.mxu1 }
 0x637   :  { %2712 = vmatmul.mubr.msk.bf16.vlgmr.msra.gmra.mxu1 %vm590_vm3, %v1982_v54 }
 0x638   :  { %v1954_v1 = vadd.f32 %v4029_v3, %v1899_v39  ;;  %2767 = vmatpush3.bf16.msra.mxu1 %v2807_v24  ;;  %v4058_v33 = vadd.f32 %v1956_v27, %v3446_v62 }
 0x639   :  { %2760 = vmatprep.subr.bf16.mxu1 %v4013_v22 }
 0x63a   :  { %v4065_v42 = vadd.f32 %v1954_v1, %v3388_v37  ;;  %v1984_v62 = vpack.c.bf16 %v4058_v33, %v4068_v16  ;;  %v1777_v37 = vpop.f32.mrf.mxu1 }
 0x63c   :  { %v1983_v8 = vpack.c.bf16 %v4065_v42, %v4062_v19  ;;  %2768 = vmatpush3.bf16.msra.mxu1 %v4013_v22  ;;  %v2678_v40 = vpop.f32.mrf.mxu1 }
 0x63d   :  { %2761 = vmatprep.subr.bf16.mxu1 %v2809_v32 }
 0x63e   :  { %2715 = vmatprep.mubr.msk.bf16.mxu1 %vm590_vm3, %v1983_v8  ;;  %v1780_v60 = vpop.f32.mrf.mxu1 }
 0x63f   :  { %2716 = vmatmul.mubr.msk.bf16.gmra.mxu1 %vm590_vm3, %v1984_v62 }
 0x640   :  { %2769 = vmatpush3.bf16.msra.mxu1 %v2809_v32  ;;  %v2681_v21 = vpop.f32.mrf.mxu1 }
 0x641   :  { %2762 = vmatprep.subr.bf16.mxu1 %v2810_v45 }
 0x642   :  { %v1793_v55 = vpop.f32.mrf.mxu1 }
 0x644   :  { %2770 = vmatpush3.bf16.msra.mxu1 %v2810_v45  ;;  %v2682_v61 = vpop.f32.mrf.mxu1 }
 0x645   :  { %2763 = vmatprep.subr.bf16.mxu1 %v2811_v49 }
 0x646   :  { %v1796_v34 = vpop.f32.mrf.mxu1 }
 0x648   :  { %2771 = vmatpush3.bf16.msra.mxu1 %v2811_v49 }
 0x649   :  { %2764 = vmatprep.subr.bf16.mxu1 %v2812_v59 }
 0x64c   :  { %2772 = vmatpush3.bf16.msra.mxu1 %v2812_v59 }
 0x64d   :  { %2765 = vmatprep.subr.bf16.mxu1 %v2813_v50 }
 0x650   :  { %2773 = vmatpush3.bf16.msra.mxu1 %v2813_v50 }
 0x678   :  { %v2697_v30 = vpop.f32.mrf.mxu0 }
 0x679   :  { %v1920_v22 = vadd.f32 %v2697_v30, %v2677_v5 }
 0x67a   :  { %v1911_v2 = vpop.f32.mrf.mxu0 }
 0x67b   :  { %v1912_v24 = vadd.f32 %v1911_v2, %v1777_v37  ;;  %v1959_v36 = vadd.f32 %v4029_v3, %v1920_v22 }
 0x67c   :  { %v2698_v26 = vpop.f32.mrf.mxu0 }
 0x67d   :  { %v1923_v58 = vadd.f32 %v2698_v26, %v2678_v40  ;;  %v1957_v45 = vadd.f32 %v4029_v3, %v1912_v24  ;;  %v4097_v0 = vadd.f32 %v1959_v36, %v3515_v35 }
 0x67e   :  { %v1914_v32 = vpop.f32.mrf.mxu0 }
 0x67f   :  { %v1960_v49 = vadd.f32 %v4029_v3, %v1923_v58  ;;  %v1915_v10 = vadd.f32 %v1914_v32, %v1780_v60  ;;  %v4091_v9 = vadd.f32 %v1957_v45, %v3275_v56 }
 0x681   :  { %v1958_v15 = vadd.f32 %v4029_v3, %v1915_v10  ;;  %v4085_v52 = vadd.f32 %v1960_v49, %v3554_v18  ;;  %v2814_v18 = vld [vmem:[%s4204_s12] sm:$0xff]  }
 0x682   :  { %2741 = vmatprep.subr.bf16.mxu0 %v2814_v18  ;;  %2766 = vmatprep.subr.bf16.mxu1 %v2814_v18 }
 0x683   :  { %v4094_v31 = vadd.f32 %v1958_v15, %v3485_v25  ;;  %v2701_v43 = vpop.f32.mrf.mxu0  ;;  %v1986_v56 = vpack.c.bf16 %v4085_v52, %v4097_v0  ;;  %2742 = vmatpush3.bf16.msra.mxu0 %v2814_v18  ;;  %2774 = vmatpush3.bf16.msra.mxu1 %v2814_v18 }
 0x684   :  { %v1936_v35 = vadd.f32 %v2701_v43, %v2681_v21 }
 0x685   :  { %v1985_v13 = vpack.c.bf16 %v4094_v31, %v4091_v9  ;;  %v1927_v11 = vpop.f32.mrf.mxu0 }
 0x686   :  { %v1928_v25 = vadd.f32 %v1927_v11, %v1793_v55  ;;  %v1963_v29 = vadd.f32 %v4029_v3, %v1936_v35 }
 0x687   :  { %v2702_v47 = vpop.f32.mrf.mxu0  ;;  %2719 = vmatprep.mubr.msk.bf16.mxu1 %vm590_vm3, %v1985_v13 }
 0x688   :  { %v1939_v53 = vadd.f32 %v2702_v47, %v2682_v61  ;;  %2720 = vmatmul.mubr.msk.bf16.gmra.mxu1 %vm590_vm3, %v1986_v56  ;;  %v1961_v41 = vadd.f32 %v4029_v3, %v1928_v25  ;;  %v4122_v51 = vadd.f32 %v1963_v29, %v3614_v44 }
 0x689   :  { %v1930_v14 = vpop.f32.mrf.mxu0 }
 0x68a   :  { %v1964_v63 = vadd.f32 %v4029_v3, %v1939_v53  ;;  %v1931_v38 = vadd.f32 %v1930_v14, %v1796_v34  ;;  %v4116_v54 = vadd.f32 %v1961_v41, %v3578_v57  ;;  %v2455_v57 = vld [vmem:[%s4203_s11] ss:$0 sm:$0xff] }
 0x68c   :  { %v1962_v4 = vadd.f32 %v4029_v3, %v1931_v38  ;;  %v4113_v20 = vadd.f32 %v1964_v63, %v3625_v17 }
 0x68e   :  { %v4119_v46 = vadd.f32 %v1962_v4, %v3603_v6  ;;  %v1988_v39 = vpack.c.bf16 %v4113_v20, %v4122_v51 }
 0x690   :  { %v1987_v27 = vpack.c.bf16 %v4119_v46, %v4116_v54 }
 0x692   :  { %2723 = vmatprep.mubr.msk.bf16.mxu1 %vm590_vm3, %v1987_v27 }
 0x693   :  { %2724 = vmatmul.mubr.msk.bf16.gmra.mxu1 %vm590_vm3, %v1988_v39 }
 0x6f7   :  { %v2713_v17 = vpop.f32.mrf.mxu1 }
 0x6f8   :  { %v2095_v1 = vadd.f32 %v2713_v17, %v2455_v57 }
 0x6f9   :  { %v2086_v3 = vpop.f32.mrf.mxu1 }
 0x6fa   :  { %v2087_v28 = vadd.f32 %v2455_v57, %v2086_v3  ;;  %v2151_v60 = vmax.f32 %v2095_v1, 0.0 }
 0x6fb   :  { %v2714_v6 = vpop.f32.mrf.mxu1 }
 0x6fc   :  { %v2098_v44 = vadd.f32 %v2714_v6, %v2455_v57  ;;  %v2149_v40 = vmax.f32 %v2087_v28, 0.0 }
 0x6fd   :  { %v2089_v8 = vpop.f32.mrf.mxu1 }
 0x6fe   :  { %v2090_v62 = vadd.f32 %v2455_v57, %v2089_v8  ;;  %v2152_v5 = vmax.f32 %v2098_v44, 0.0 }
 0x6ff   :  { %v2717_v37 = vpop.f32.mrf.mxu1 }
 0x700   :  { %v2150_v30 = vmax.f32 %v2090_v62, 0.0  ;;  %v2166_v22 = vpack.c.bf16 %v2152_v5, %v2151_v60  ;;  %v2111_v21 = vadd.f32 %v2717_v37, %v2455_v57  ;;  %v4136_v37 = vld [vmem:[%s4205_s13] ss:$0 sm:$0xff]  ;;  %s2978_s13 = smov [#allocation8]  }
 0x701   :  { %v2102_v2 = vpop.f32.mrf.mxu1  ;;  %s2378_s20 = sshll.u32 %s2978_s13, 4  ;;  %s2379_s20 = int_to_ptr.vmem [resolvable:$true] %s2378_s20 }
 0x702   :  { %v2165_v24 = vpack.c.bf16 %v2150_v30, %v2149_v40  ;;  %v2103_v59 = vadd.f32 %v2455_v57, %v2102_v2  ;;  %v2155_v15 = vmax.f32 %v2111_v21, 0.0  ;;  %s2943_s21 = scalar_lea.vmem %s2379_s20, 2048  ;;  %p2948_p2 = scmp.lt.s32.totalorder %s2379_s20, %s2379_s20 }
 0x703   :  { %v2718_v26 = vpop.f32.mrf.mxu1  ;;  %p2944_p1 = scmp.ne.s32.totalorder %s2379_s20, %s2943_s21  ;;  %p2949_p3 = scmp.lt.s32.totalorder %s2943_s21, %s2943_s21 }
 0x704   :  { %v2114_v58 = vadd.f32 %v2718_v26, %v2455_v57  ;;  %2743 = vmatprep.mubr.bf16.mxu0 %v2165_v24  ;;  %v2153_v10 = vmax.f32 %v2103_v59, 0.0 }
 0x705   :  { %v2105_v32 = vpop.f32.mrf.mxu1  ;;  %2744 = vmatmul.mubr.bf16.vlgmr.msra.gmra.mxu0 %v2166_v22  ;;  %p2950_p4 = por %p2949_p3, %p2948_p2 }
 0x706   :  { %v2106_v45 = vadd.f32 %v2455_v57, %v2105_v32  ;;  %v2156_v49 = vmax.f32 %v2114_v58, 0.0 }
 0x707   :  { %p2951_p5 = pnand %p2950_p4, %p2944_p1 }
 0x708   :  { %v2154_v36 = vmax.f32 %v2106_v45, 0.0  ;;  %v2168_v50 = vpack.c.bf16 %v2156_v49, %v2155_v15 }
 0x70a   :  { %v2167_v55 = vpack.c.bf16 %v2154_v36, %v2153_v10 }
 0x70c   :  { %2747 = vmatprep.mubr.bf16.mxu0 %v2167_v55 }
 0x70d   :  { %2748 = vmatmul.mubr.bf16.gmra.mxu0 %v2168_v50 }
 0x748   :  { %v2721_v43 = vpop.f32.mrf.mxu1 }
 0x749   :  { %v2127_v56 = vadd.f32 %v2721_v43, %v2455_v57 }
 0x74a   :  { %v2118_v18 = vpop.f32.mrf.mxu1 }
 0x74b   :  { %v2119_v61 = vadd.f32 %v2455_v57, %v2118_v18  ;;  %v2159_v14 = vmax.f32 %v2127_v56, 0.0 }
 0x74c   :  { %v2722_v13 = vpop.f32.mrf.mxu1 }
 0x74d   :  { %v2130_v11 = vadd.f32 %v2722_v13, %v2455_v57  ;;  %v2157_v53 = vmax.f32 %v2119_v61, 0.0 }
 0x74e   :  { %v2121_v25 = vpop.f32.mrf.mxu1 }
 0x74f   :  { %v2122_v35 = vadd.f32 %v2455_v57, %v2121_v25  ;;  %v2160_v47 = vmax.f32 %v2130_v11, 0.0 }
 0x751   :  { %v2158_v34 = vmax.f32 %v2122_v35, 0.0  ;;  %v2170_v38 = vpack.c.bf16 %v2160_v47, %v2159_v14 }
 0x753   :  { %v2169_v41 = vpack.c.bf16 %v2158_v34, %v2157_v53  ;;  %v2725_v63 = vpop.f32.mrf.mxu1 }
 0x754   :  { %v2143_v17 = vadd.f32 %v2725_v63, %v2455_v57 }
 0x755   :  { %v2134_v29 = vpop.f32.mrf.mxu1  ;;  %2751 = vmatprep.mubr.bf16.mxu0 %v2169_v41 }
 0x756   :  { %2752 = vmatmul.mubr.bf16.gmra.mxu0 %v2170_v38  ;;  %v2135_v27 = vadd.f32 %v2455_v57, %v2134_v29  ;;  %v2163_v8 = vmax.f32 %v2143_v17, 0.0 }
 0x757   :  { %v2726_v4 = vpop.f32.mrf.mxu1 }
 0x758   :  { %v2146_v39 = vadd.f32 %v2726_v4, %v2455_v57  ;;  %v2161_v44 = vmax.f32 %v2135_v27, 0.0 }
 0x759   :  { %v2137_v3 = vpop.f32.mrf.mxu1 }
 0x75a   :  { %v2138_v6 = vadd.f32 %v2455_v57, %v2137_v3  ;;  %v2164_v28 = vmax.f32 %v2146_v39, 0.0 }
 0x75c   :  { %v2162_v1 = vmax.f32 %v2138_v6, 0.0  ;;  %v2172_v5 = vpack.c.bf16 %v2164_v28, %v2163_v8 }
 0x75e   :  { %v2171_v62 = vpack.c.bf16 %v2162_v1, %v2161_v44 }
 0x760   :  { %2755 = vmatprep.mubr.bf16.mxu1 %v2171_v62 }
 0x761   :  { %2756 = vmatmul.mubr.bf16.vlgmr.msra.gmra.mxu1 %v2172_v5 }
 0x7c5   :  { %v2745_v40 = vpop.f32.mrf.mxu0 }
 0x7c6   :  { %v2287_v30 = vadd.f32 %v2745_v40, %v4136_v37 }
 0x7c7   :  { %v2278_v60 = vpop.f32.mrf.mxu0 }
 0x7c8   :  { %v2343_v2 = vadd.f32 %v2287_v30, %v4045_v23  ;;  %v2279_v57 = vadd.f32 %v4136_v37, %v2278_v60 }
 0x7c9   :  { %v2746_v24 = vpop.f32.mrf.mxu0 }
 0x7ca   :  { %2359 = vst.msk [vmem:[#allocation8 + $0x10] sm:$0xff] %vm590_vm3, %v2343_v2  ;;  %v2341_v22 = vadd.f32 %v2279_v57, %v4039_v48  ;;  %v2290_v26 = vadd.f32 %v2746_v24, %v4136_v37 }
 0x7cb   :  { %v2281_v59 = vpop.f32.mrf.mxu0 }
 0x7cc   :  { %2357 = vst.msk [vmem:[#allocation8] sm:$0xff] %vm590_vm3, %v2341_v22  ;;  %v2344_v58 = vadd.f32 %v2290_v26, %v4036_v12  ;;  %v2282_v21 = vadd.f32 %v4136_v37, %v2281_v59 }
 0x7cd   :  { %v2749_v32 = vpop.f32.mrf.mxu0 }
 0x7ce   :  { %2360 = vst.msk [vmem:[#allocation8 + $0x18] sm:$0xff] %vm590_vm3, %v2344_v58  ;;  %v2342_v23 = vadd.f32 %v2282_v21, %v4042_v7  ;;  %v2303_v45 = vadd.f32 %v2749_v32, %v4136_v37 }
 0x7cf   :  { %v2294_v49 = vpop.f32.mrf.mxu0 }
 0x7d0   :  { %2358 = vst.msk [vmem:[#allocation8 + $0x8] sm:$0xff] %vm590_vm3, %v2342_v23  ;;  %v2347_v48 = vadd.f32 %v2303_v45, %v4068_v16  ;;  %v2295_v10 = vadd.f32 %v4136_v37, %v2294_v49 }
 0x7d1   :  { %v2750_v36 = vpop.f32.mrf.mxu0 }
 0x7d2   :  { %2363 = vst.msk [vmem:[#allocation8 + $0x30] sm:$0xff] %vm590_vm3, %v2347_v48  ;;  %v2345_v12 = vadd.f32 %v2295_v10, %v4062_v19  ;;  %v2306_v15 = vadd.f32 %v2750_v36, %v4136_v37 }
 0x7d3   :  { %v2297_v55 = vpop.f32.mrf.mxu0 }
 0x7d4   :  { %2361 = vst.msk [vmem:[#allocation8 + $0x20] sm:$0xff] %vm590_vm3, %v2345_v12  ;;  %v2348_v7 = vadd.f32 %v2306_v15, %v4058_v33  ;;  %v2298_v50 = vadd.f32 %v4136_v37, %v2297_v55 }
 0x7d6   :  { %2364 = vst.msk [vmem:[#allocation8 + $0x38] sm:$0xff] %vm590_vm3, %v2348_v7  ;;  %v2346_v16 = vadd.f32 %v2298_v50, %v4065_v42 }
 0x7d8   :  { %2362 = vst.msk [vmem:[#allocation8 + $0x28] sm:$0xff] %vm590_vm3, %v2346_v16 }
 0x816   :  { %v2753_v43 = vpop.f32.mrf.mxu0 }
 0x817   :  { %v2319_v18 = vadd.f32 %v2753_v43, %v4136_v37 }
 0x818   :  { %v2310_v13 = vpop.f32.mrf.mxu0 }
 0x819   :  { %v2351_v19 = vadd.f32 %v2319_v18, %v4097_v0  ;;  %v2311_v61 = vadd.f32 %v4136_v37, %v2310_v13 }
 0x81a   :  { %v2754_v11 = vpop.f32.mrf.mxu0 }
 0x81b   :  { %2367 = vst.msk [vmem:[#allocation8 + $0x50] sm:$0xff] %vm590_vm3, %v2351_v19  ;;  %v2349_v33 = vadd.f32 %v2311_v61, %v4091_v9  ;;  %v2322_v56 = vadd.f32 %v2754_v11, %v4136_v37 }
 0x81c   :  { %v2313_v25 = vpop.f32.mrf.mxu0 }
 0x81d   :  { %2365 = vst.msk [vmem:[#allocation8 + $0x40] sm:$0xff] %vm590_vm3, %v2349_v33  ;;  %v2352_v42 = vadd.f32 %v2322_v56, %v4085_v52  ;;  %v2314_v35 = vadd.f32 %v4136_v37, %v2313_v25 }
 0x81f   :  { %2368 = vst.msk [vmem:[#allocation8 + $0x58] sm:$0xff] %vm590_vm3, %v2352_v42  ;;  %v2350_v0 = vadd.f32 %v2314_v35, %v4094_v31 }
 0x821   :  { %2366 = vst.msk [vmem:[#allocation8 + $0x48] sm:$0xff] %vm590_vm3, %v2350_v0  ;;  %v2757_v47 = vpop.f32.mrf.mxu1 }
 0x822   :  { %v2335_v53 = vadd.f32 %v2757_v47, %v4136_v37 }
 0x823   :  { %v2326_v34 = vpop.f32.mrf.mxu1 }
 0x824   :  { %v2355_v9 = vadd.f32 %v2335_v53, %v4122_v51  ;;  %v2327_v14 = vadd.f32 %v4136_v37, %v2326_v34 }
 0x825   :  { %v2758_v41 = vpop.f32.mrf.mxu1 }
 0x826   :  { %2371 = vst.msk [vmem:[#allocation8 + $0x70] sm:$0xff] %vm590_vm3, %v2355_v9  ;;  %v2353_v52 = vadd.f32 %v2327_v14, %v4116_v54  ;;  %v2338_v63 = vadd.f32 %v2758_v41, %v4136_v37 }
 0x827   :  { %v2329_v38 = vpop.f32.mrf.mxu1 }
 0x828   :  { %2369 = vst.msk [vmem:[#allocation8 + $0x60] sm:$0xff] %vm590_vm3, %v2353_v52  ;;  %v2356_v31 = vadd.f32 %v2338_v63, %v4113_v20  ;;  %v2330_v29 = vadd.f32 %v4136_v37, %v2329_v38 }
 0x82a   :  { %2372 = vst.msk [vmem:[#allocation8 + $0x78] sm:$0xff] %vm590_vm3, %v2356_v31  ;;  %v2354_v51 = vadd.f32 %v2330_v29, %v4119_v46 }
 0x82c   :  { %2370 = vst.msk [vmem:[#allocation8 + $0x68] sm:$0xff] %vm590_vm3, %v2354_v51 }
 0x82d   :  { %2954 = shalt.err (!%p2951_p5)
}
 0x82e   :  { %2384 = dma.vmem_to_hbm [thread:$0]  %s2379_s20, 2048, %s4206_s14, [#allocation4], %s2971_s18, %s2971_s18, %s2972_s19  }
 0x82f   :  { %2967 = dma.done.wait [#allocation4], 2048  }
 0x830   :  { %2968 = vsyncadd [#allocation4], 4294965248 }
 0x831   :  { %2388 = vsyncpa [#allocation3], 1 }
 0x832   :  { %2389 = vsyncpa [#allocation6], 1 }
 0x833   :  { %2390 = vsyncpa [#allocation4], 1 }

</bundles_post_ra>
